<compile_context>
chip_gen: v7x
topology: tpu7x:2x2x1
jax: 0.10.0
libtpu: 0.0.40
codegen_flags: <defaults>
</compile_context>

<pallas_src>
import jax
import jax.numpy as jnp
from jax.experimental import pallas as pl
from jax.experimental.pallas import tpu as pltpu

EPS = 1e-5


def bl_p2a_kernel(x_ref, w1_ref, vec_ref, wstack_hbm, w6_hbm, out_ref,
                  wbuf, w6buf, sem):
    # --- kick off all big-weight DMAs immediately; they overlap layer-1 ---
    cp0 = pltpu.make_async_copy(wstack_hbm.at[0], wbuf.at[0], sem.at[0])
    cp1 = pltpu.make_async_copy(wstack_hbm.at[1], wbuf.at[1], sem.at[1])
    cp2 = pltpu.make_async_copy(wstack_hbm.at[2], wbuf.at[2], sem.at[2])
    cp6 = pltpu.make_async_copy(w6_hbm, w6buf, sem.at[3])
    cp0.start()
    cp1.start()
    cp2.start()
    cp6.start()

    x = x_ref[...]                     # (B, 9)

    # Static slices of the stacked per-feature vector slab (9, 256).
    g1, be1 = vec_ref[0:1, :], vec_ref[1:2, :]
    g2, be2 = vec_ref[2:3, :], vec_ref[3:4, :]
    g3, be3 = vec_ref[4:5, :], vec_ref[5:6, :]
    g5, be5 = vec_ref[6:7, :], vec_ref[7:8, :]
    b6 = vec_ref[8:9, 0:128]           # padded final bias (only cols 0..2 used)

    inv_b = 1.0 / x.shape[0]

    def bn_relu(h, gamma, beta):
        # Training-mode BN folded into per-feature scale/shift.  h*h is
        # computed once and both reductions are fed from it; scale/shift and
        # statistics stay in f32.
        hh = h * h
        mean = jnp.sum(h, axis=0, keepdims=True) * inv_b             # (1, F)
        meansq = jnp.sum(hh, axis=0, keepdims=True) * inv_b          # (1, F)
        var = meansq - mean * mean
        scale = gamma * jax.lax.rsqrt(var + EPS)                     # (1, F)
        shift = beta - mean * scale                                  # (1, F)
        return jnp.maximum(h * scale + shift, 0.0)

    # Layer 1 (tiny 9x256 weight arrives via the VMEM BlockSpec; the big
    # weights are still in flight during this compute).
    h = bn_relu(jnp.dot(x, w1_ref[...], preferred_element_type=jnp.float32),
                g1, be1)

    # Trunk layers 2-3: wait only on the weight needed next.
    cp0.wait()
    h = bn_relu(jnp.dot(h, wbuf[0], preferred_element_type=jnp.float32),
                g2, be2)
    cp1.wait()
    h = bn_relu(jnp.dot(h, wbuf[1], preferred_element_type=jnp.float32),
                g3, be3)

    # Fused heads: one 256->256 matmul + one BN/ReLU (cols 0..127 = "l" head,
    # cols 128..255 = "t" head; per-feature BN == separate per-head BNs).
    cp2.wait()
    h = bn_relu(jnp.dot(h, wbuf[2], preferred_element_type=jnp.float32),
                g5, be5)

    # Block-diagonal final projection into one lane-dense (B, 128) slab.
    cp6.wait()
    out_ref[...] = (
        jnp.dot(h, w6buf[...], preferred_element_type=jnp.float32) + b6
    )


def prepare_params(params):
    """One-time packing of the raw module parameters into the kernel's
    layout (run OUTSIDE the jitted hot path)."""
    (w1, b1, g1, be1, w2, b2, g2, be2, w3, b3, g3, be3,
     w5l, b5l, g5l, be5l, w6l, b6l, w5t, b5t, g5t, be5t, w6t, b6t) = params
    del b1, b2, b3, b5l, b5t  # cancelled exactly by training-mode BN mean subtraction

    # Head fusion: w5l||w5t -> one (256,256) matmul + one BN/ReLU.
    w5 = jnp.concatenate([w5l, w5t], axis=1)      # (256, 256)
    g5 = jnp.concatenate([g5l, g5t], axis=1)      # (1, 256)
    be5 = jnp.concatenate([be5l, be5t], axis=1)   # (1, 256)

    # Block-diagonal final weight, lane-padded to 128 output columns:
    # rows 0..127 ("l" features) -> cols 0..1; rows 128..255 ("t") -> col 2.
    w6 = jnp.zeros((256, 128), jnp.float32)
    w6 = w6.at[:128, 0:2].set(w6l)
    w6 = w6.at[128:, 2:3].set(w6t)
    b6 = jnp.zeros((1, 256), jnp.float32)
    b6 = b6.at[:, 0:2].set(b6l)
    b6 = b6.at[:, 2:3].set(b6t)

    w_stack = jnp.stack([w2, w3, w5], axis=0)                            # (3, 256, 256)
    vec_stack = jnp.concatenate([g1, be1, g2, be2, g3, be3, g5, be5, b6],
                                axis=0)                                  # (9, 256)

    packed = (w1, w_stack, w6, vec_stack)
    return jax.block_until_ready(packed)


def _vmem_limit_bytes(B):
    """Explicit, B-derived VMEM budget (weights + activations + headroom)."""
    weight_bytes = (3 * 256 * 256 + 256 * 128 + 9 * 256 + 9 * 256) * 4
    act_bytes = B * 256 * 4 * 8          # several live (B,256) f32 slabs incl. h*h
    io_bytes = B * (128 + 128) * 4       # lane-padded x + output slab
    needed = weight_bytes + act_bytes + io_bytes + (2 << 20)  # compiler headroom
    return int(min(64 << 20, max(8 << 20, needed)))


def bl_p2a_forward(x, packed):
    w1, w_stack, w6, vec_stack = packed
    B = x.shape[0]

    vmem = pl.BlockSpec(memory_space=pltpu.MemorySpace.VMEM)
    hbm = pl.BlockSpec(memory_space=pl.ANY)   # big weights: manual overlapped DMA

    out = pl.pallas_call(
        bl_p2a_kernel,
        out_shape=jax.ShapeDtypeStruct((B, 128), jnp.float32),
        in_specs=[vmem, vmem, vmem, hbm, hbm],
        out_specs=vmem,
        scratch_shapes=[
            pltpu.VMEM((3, 256, 256), jnp.float32),   # trunk/head weights
            pltpu.VMEM((256, 128), jnp.float32),      # block-diag final weight
            pltpu.SemaphoreType.DMA((4,)),
        ],
        compiler_params=pltpu.CompilerParams(
            vmem_limit_bytes=_vmem_limit_bytes(B)),
    )(x, w1, vec_stack, w_stack, w6)

    return out[:, 0:2], out[:, 2:3]


def init_params(key):
    """Deterministic synthetic parameters matching the module's shapes.
    Linear weights are stored as (in, out)  (i.e. PyTorch W.T)."""

    def linear(key, fan_in, fan_out):
        k1, k2 = jax.random.split(key)
        bound = 1.0 / jnp.sqrt(fan_in)
        w = jax.random.uniform(k1, (fan_in, fan_out), jnp.float32, -bound, bound)
        b = jax.random.uniform(k2, (1, fan_out), jnp.float32, -bound, bound)
        return w, b

    def bn(key, n):
        k1, k2 = jax.random.split(key)
        gamma = 1.0 + 0.1 * jax.random.normal(k1, (1, n), jnp.float32)
        beta = 0.1 * jax.random.normal(k2, (1, n), jnp.float32)
        return gamma, beta

    keys = jax.random.split(key, 13)
    w1, b1 = linear(keys[0], 9, 256)
    g1, be1 = bn(keys[1], 256)
    w2, b2 = linear(keys[2], 256, 256)
    g2, be2 = bn(keys[3], 256)
    w3, b3 = linear(keys[4], 256, 256)
    g3, be3 = bn(keys[5], 256)
    w5l, b5l = linear(keys[6], 256, 128)
    g5l, be5l = bn(keys[7], 128)
    w6l, b6l = linear(keys[8], 128, 2)
    w5t, b5t = linear(keys[9], 256, 128)
    g5t, be5t = bn(keys[10], 128)
    w6t, b6t = linear(keys[11], 128, 1)

    return (
        w1, b1, g1, be1,
        w2, b2, g2, be2,
        w3, b3, g3, be3,
        w5l, b5l, g5l, be5l,
        w6l, b6l,
        w5t, b5t, g5t, be5t,
        w6t, b6t,
    )


def reference_forward(x, params):
    """Faithful JAX port of the PyTorch module (biases included, unfused)."""
    (w1, b1, g1, be1, w2, b2, g2, be2, w3, b3, g3, be3,
     w5l, b5l, g5l, be5l, w6l, b6l, w5t, b5t, g5t, be5t, w6t, b6t) = params

    def bn_relu(h, g, be):
        m = jnp.mean(h, axis=0, keepdims=True)
        v = jnp.mean((h - m) ** 2, axis=0, keepdims=True)
        return jnp.maximum((h - m) / jnp.sqrt(v + EPS) * g + be, 0.0)

    h = bn_relu(x @ w1 + b1, g1, be1)
    h = bn_relu(h @ w2 + b2, g2, be2)
    h = bn_relu(h @ w3 + b3, g3, be3)
    xl = bn_relu(h @ w5l + b5l, g5l, be5l) @ w6l + b6l
    xt = bn_relu(h @ w5t + b5t, g5t, be5t) @ w6t + b6t
    return xl, xt


if __name__ == "__main__":
    key = jax.random.PRNGKey(0)
    kx, kp = jax.random.split(key)

    B = 8  # batch (>1 required by BatchNorm1d training-mode semantics)
    x = jax.random.normal(kx, (B, 9), jnp.float32)
    params = init_params(kp)

    packed = prepare_params(params)       # one-time, outside the hot path
    fwd = jax.jit(bl_p2a_forward)
    out_l, out_t = fwd(x, packed)
    jax.block_until_ready((out_l, out_t))

    ref_l, ref_t = reference_forward(x, params)
    assert out_l.shape == (B, 2) and out_t.shape == (B, 1)
    assert jnp.allclose(out_l, ref_l, atol=1e-4, rtol=1e-4)
    assert jnp.allclose(out_t, ref_t, atol=1e-4, rtol=1e-4)

    print("KERNEL_OK")
</pallas_src>

<mosaic_0001>
module attributes {stable_mosaic.version = 11 : i64} {
  func.func @bl_p2a_kernel(%arg0: memref<8x9xf32, #tpu.memory_space<vmem>>, %arg1: memref<9x256xf32, #tpu.memory_space<vmem>>, %arg2: memref<9x256xf32, #tpu.memory_space<vmem>>, %arg3: memref<3x256x256xf32, #tpu.memory_space<any>>, %arg4: memref<256x128xf32, #tpu.memory_space<any>>, %arg5: memref<8x128xf32, #tpu.memory_space<vmem>>, %arg6: memref<3x256x256xf32, #tpu.memory_space<vmem>>, %arg7: memref<256x128xf32, #tpu.memory_space<vmem>>, %arg8: memref<4x!tpu.dma_semaphore, #tpu.memory_space<semaphore_mem>>) attributes {dimension_semantics = [], scalar_prefetch = 0 : i64, scratch_operands = 3 : i64, tpu.core_type = #tpu.core_type<tc>} {
    %c0_i32 = arith.constant 0 : i32
    %c0_i32_0 = arith.constant 0 : i32
    %c0_i32_1 = arith.constant 0 : i32
    %c0_i32_2 = arith.constant 0 : i32
    %c0_i32_3 = arith.constant 0 : i32
    %0 = tpu.memref_slice %arg3[%c0_i32, %c0_i32_2, %c0_i32_3] : memref<3x256x256xf32, #tpu.memory_space<any>> -> memref<1x256x256xf32, #tpu.memory_space<any>>
    %1 = tpu.memref_squeeze %0 : memref<1x256x256xf32, #tpu.memory_space<any>> -> memref<256x256xf32, #tpu.memory_space<any>>
    %c0_i32_4 = arith.constant 0 : i32
    %c0_i32_5 = arith.constant 0 : i32
    %2 = tpu.memref_slice %arg6[%c0_i32_0, %c0_i32_4, %c0_i32_5] : memref<3x256x256xf32, #tpu.memory_space<vmem>> -> memref<1x256x256xf32, #tpu.memory_space<vmem>>
    %3 = tpu.memref_squeeze %2 : memref<1x256x256xf32, #tpu.memory_space<vmem>> -> memref<256x256xf32, #tpu.memory_space<vmem>>
    %4 = tpu.memref_slice %arg8[%c0_i32_1] : memref<4x!tpu.dma_semaphore, #tpu.memory_space<semaphore_mem>> -> memref<1x!tpu.dma_semaphore, #tpu.memory_space<semaphore_mem>>
    %5 = tpu.memref_squeeze %4 : memref<1x!tpu.dma_semaphore, #tpu.memory_space<semaphore_mem>> -> memref<!tpu.dma_semaphore, #tpu.memory_space<semaphore_mem>>
    tpu.enqueue_dma source(%1 : memref<256x256xf32, #tpu.memory_space<any>>) target(%3 : memref<256x256xf32, #tpu.memory_space<vmem>>) target_semaphore(%5 : memref<!tpu.dma_semaphore, #tpu.memory_space<semaphore_mem>>)
    %c1_i32 = arith.constant 1 : i32
    %c1_i32_6 = arith.constant 1 : i32
    %c1_i32_7 = arith.constant 1 : i32
    %c0_i32_8 = arith.constant 0 : i32
    %c0_i32_9 = arith.constant 0 : i32
    %6 = tpu.memref_slice %arg3[%c1_i32, %c0_i32_8, %c0_i32_9] : memref<3x256x256xf32, #tpu.memory_space<any>> -> memref<1x256x256xf32, #tpu.memory_space<any>>
    %7 = tpu.memref_squeeze %6 : memref<1x256x256xf32, #tpu.memory_space<any>> -> memref<256x256xf32, #tpu.memory_space<any>>
    %c0_i32_10 = arith.constant 0 : i32
    %c0_i32_11 = arith.constant 0 : i32
    %8 = tpu.memref_slice %arg6[%c1_i32_6, %c0_i32_10, %c0_i32_11] : memref<3x256x256xf32, #tpu.memory_space<vmem>> -> memref<1x256x256xf32, #tpu.memory_space<vmem>>
    %9 = tpu.memref_squeeze %8 : memref<1x256x256xf32, #tpu.memory_space<vmem>> -> memref<256x256xf32, #tpu.memory_space<vmem>>
    %10 = tpu.memref_slice %arg8[%c1_i32_7] : memref<4x!tpu.dma_semaphore, #tpu.memory_space<semaphore_mem>> -> memref<1x!tpu.dma_semaphore, #tpu.memory_space<semaphore_mem>>
    %11 = tpu.memref_squeeze %10 : memref<1x!tpu.dma_semaphore, #tpu.memory_space<semaphore_mem>> -> memref<!tpu.dma_semaphore, #tpu.memory_space<semaphore_mem>>
    tpu.enqueue_dma source(%7 : memref<256x256xf32, #tpu.memory_space<any>>) target(%9 : memref<256x256xf32, #tpu.memory_space<vmem>>) target_semaphore(%11 : memref<!tpu.dma_semaphore, #tpu.memory_space<semaphore_mem>>)
    %c2_i32 = arith.constant 2 : i32
    %c2_i32_12 = arith.constant 2 : i32
    %c2_i32_13 = arith.constant 2 : i32
    %c0_i32_14 = arith.constant 0 : i32
    %c0_i32_15 = arith.constant 0 : i32
    %12 = tpu.memref_slice %arg3[%c2_i32, %c0_i32_14, %c0_i32_15] : memref<3x256x256xf32, #tpu.memory_space<any>> -> memref<1x256x256xf32, #tpu.memory_space<any>>
    %13 = tpu.memref_squeeze %12 : memref<1x256x256xf32, #tpu.memory_space<any>> -> memref<256x256xf32, #tpu.memory_space<any>>
    %c0_i32_16 = arith.constant 0 : i32
    %c0_i32_17 = arith.constant 0 : i32
    %14 = tpu.memref_slice %arg6[%c2_i32_12, %c0_i32_16, %c0_i32_17] : memref<3x256x256xf32, #tpu.memory_space<vmem>> -> memref<1x256x256xf32, #tpu.memory_space<vmem>>
    %15 = tpu.memref_squeeze %14 : memref<1x256x256xf32, #tpu.memory_space<vmem>> -> memref<256x256xf32, #tpu.memory_space<vmem>>
    %16 = tpu.memref_slice %arg8[%c2_i32_13] : memref<4x!tpu.dma_semaphore, #tpu.memory_space<semaphore_mem>> -> memref<1x!tpu.dma_semaphore, #tpu.memory_space<semaphore_mem>>
    %17 = tpu.memref_squeeze %16 : memref<1x!tpu.dma_semaphore, #tpu.memory_space<semaphore_mem>> -> memref<!tpu.dma_semaphore, #tpu.memory_space<semaphore_mem>>
    tpu.enqueue_dma source(%13 : memref<256x256xf32, #tpu.memory_space<any>>) target(%15 : memref<256x256xf32, #tpu.memory_space<vmem>>) target_semaphore(%17 : memref<!tpu.dma_semaphore, #tpu.memory_space<semaphore_mem>>)
    %c3_i32 = arith.constant 3 : i32
    %18 = tpu.memref_slice %arg8[%c3_i32] : memref<4x!tpu.dma_semaphore, #tpu.memory_space<semaphore_mem>> -> memref<1x!tpu.dma_semaphore, #tpu.memory_space<semaphore_mem>>
    %19 = tpu.memref_squeeze %18 : memref<1x!tpu.dma_semaphore, #tpu.memory_space<semaphore_mem>> -> memref<!tpu.dma_semaphore, #tpu.memory_space<semaphore_mem>>
    tpu.enqueue_dma source(%arg4 : memref<256x128xf32, #tpu.memory_space<any>>) target(%arg7 : memref<256x128xf32, #tpu.memory_space<vmem>>) target_semaphore(%19 : memref<!tpu.dma_semaphore, #tpu.memory_space<semaphore_mem>>)
    %c0 = arith.constant 0 : index
    %c0_18 = arith.constant 0 : index
    %20 = vector.load %arg0[%c0, %c0_18] : memref<8x9xf32, #tpu.memory_space<vmem>>, vector<8x9xf32>
    %c0_19 = arith.constant 0 : index
    %c0_20 = arith.constant 0 : index
    %21 = vector.load %arg2[%c0_19, %c0_20] : memref<9x256xf32, #tpu.memory_space<vmem>>, vector<1x256xf32>
    %c1 = arith.constant 1 : index
    %c0_21 = arith.constant 0 : index
    %22 = vector.load %arg2[%c1, %c0_21] : memref<9x256xf32, #tpu.memory_space<vmem>>, vector<1x256xf32>
    %c2 = arith.constant 2 : index
    %c0_22 = arith.constant 0 : index
    %23 = vector.load %arg2[%c2, %c0_22] : memref<9x256xf32, #tpu.memory_space<vmem>>, vector<1x256xf32>
    %c3 = arith.constant 3 : index
    %c0_23 = arith.constant 0 : index
    %24 = vector.load %arg2[%c3, %c0_23] : memref<9x256xf32, #tpu.memory_space<vmem>>, vector<1x256xf32>
    %c4 = arith.constant 4 : index
    %c0_24 = arith.constant 0 : index
    %25 = vector.load %arg2[%c4, %c0_24] : memref<9x256xf32, #tpu.memory_space<vmem>>, vector<1x256xf32>
    %c5 = arith.constant 5 : index
    %c0_25 = arith.constant 0 : index
    %26 = vector.load %arg2[%c5, %c0_25] : memref<9x256xf32, #tpu.memory_space<vmem>>, vector<1x256xf32>
    %c6 = arith.constant 6 : index
    %c0_26 = arith.constant 0 : index
    %27 = vector.load %arg2[%c6, %c0_26] : memref<9x256xf32, #tpu.memory_space<vmem>>, vector<1x256xf32>
    %c7 = arith.constant 7 : index
    %c0_27 = arith.constant 0 : index
    %28 = vector.load %arg2[%c7, %c0_27] : memref<9x256xf32, #tpu.memory_space<vmem>>, vector<1x256xf32>
    %c8 = arith.constant 8 : index
    %c0_28 = arith.constant 0 : index
    %29 = vector.load %arg2[%c8, %c0_28] : memref<9x256xf32, #tpu.memory_space<vmem>>, vector<1x128xf32>
    %c0_29 = arith.constant 0 : index
    %c0_30 = arith.constant 0 : index
    %30 = vector.load %arg1[%c0_29, %c0_30] : memref<9x256xf32, #tpu.memory_space<vmem>>, vector<9x256xf32>
    %cst = arith.constant dense<0.000000e+00> : vector<8x256xf32>
    %31 = tpu.matmul %20, %30, %cst {dimension_numbers = #tpu.dot_dimension_numbers<[1], [0], [0], [1], [0, 0, 1, 1], [], []>} : vector<8x9xf32>, vector<9x256xf32>, vector<8x256xf32> -> vector<8x256xf32>
    %32 = arith.mulf %31, %31 : vector<8x256xf32>
    %cst_31 = arith.constant dense<0.000000e+00> : vector<256xf32>
    %33 = vector.multi_reduction <add>, %31, %cst_31 [0] : vector<8x256xf32> to vector<256xf32>
    %34 = vector.shape_cast %33 : vector<256xf32> to vector<1x256xf32>
    %cst_32 = arith.constant 1.250000e-01 : f32
    %35 = vector.broadcast %cst_32 : f32 to vector<1x256xf32>
    %36 = arith.mulf %34, %35 : vector<1x256xf32>
    %cst_33 = arith.constant dense<0.000000e+00> : vector<256xf32>
    %37 = vector.multi_reduction <add>, %32, %cst_33 [0] : vector<8x256xf32> to vector<256xf32>
    %38 = vector.shape_cast %37 : vector<256xf32> to vector<1x256xf32>
    %cst_34 = arith.constant 1.250000e-01 : f32
    %39 = vector.broadcast %cst_34 : f32 to vector<1x256xf32>
    %40 = arith.mulf %38, %39 : vector<1x256xf32>
    %41 = arith.mulf %36, %36 : vector<1x256xf32>
    %42 = arith.subf %40, %41 : vector<1x256xf32>
    %cst_35 = arith.constant 9.99999974E-6 : f32
    %43 = vector.broadcast %cst_35 : f32 to vector<1x256xf32>
    %44 = arith.addf %42, %43 : vector<1x256xf32>
    %45 = math.rsqrt %44 : vector<1x256xf32>
    %46 = arith.mulf %21, %45 : vector<1x256xf32>
    %47 = arith.mulf %36, %46 : vector<1x256xf32>
    %48 = arith.subf %22, %47 : vector<1x256xf32>
    %49 = vector.broadcast %46 : vector<1x256xf32> to vector<8x256xf32>
    %50 = arith.mulf %31, %49 : vector<8x256xf32>
    %51 = vector.broadcast %48 : vector<1x256xf32> to vector<8x256xf32>
    %52 = arith.addf %50, %51 : vector<8x256xf32>
    %cst_36 = arith.constant 0.000000e+00 : f32
    %53 = vector.broadcast %cst_36 : f32 to vector<8x256xf32>
    %54 = arith.maximumf %52, %53 : vector<8x256xf32>
    %c0_i32_37 = arith.constant 0 : i32
    %c0_i32_38 = arith.constant 0 : i32
    %c0_i32_39 = arith.constant 0 : i32
    %c0_i32_40 = arith.constant 0 : i32
    %c0_i32_41 = arith.constant 0 : i32
    %55 = tpu.memref_slice %arg3[%c0_i32_37, %c0_i32_40, %c0_i32_41] : memref<3x256x256xf32, #tpu.memory_space<any>> -> memref<1x256x256xf32, #tpu.memory_space<any>>
    %56 = tpu.memref_squeeze %55 : memref<1x256x256xf32, #tpu.memory_space<any>> -> memref<256x256xf32, #tpu.memory_space<any>>
    %c0_i32_42 = arith.constant 0 : i32
    %c0_i32_43 = arith.constant 0 : i32
    %57 = tpu.memref_slice %arg6[%c0_i32_38, %c0_i32_42, %c0_i32_43] : memref<3x256x256xf32, #tpu.memory_space<vmem>> -> memref<1x256x256xf32, #tpu.memory_space<vmem>>
    %58 = tpu.memref_squeeze %57 : memref<1x256x256xf32, #tpu.memory_space<vmem>> -> memref<256x256xf32, #tpu.memory_space<vmem>>
    %59 = tpu.memref_slice %arg8[%c0_i32_39] : memref<4x!tpu.dma_semaphore, #tpu.memory_space<semaphore_mem>> -> memref<1x!tpu.dma_semaphore, #tpu.memory_space<semaphore_mem>>
    %60 = tpu.memref_squeeze %59 : memref<1x!tpu.dma_semaphore, #tpu.memory_space<semaphore_mem>> -> memref<!tpu.dma_semaphore, #tpu.memory_space<semaphore_mem>>
    tpu.wait_dma2 semaphore(%60 : memref<!tpu.dma_semaphore, #tpu.memory_space<semaphore_mem>>) src(%56 : memref<256x256xf32, #tpu.memory_space<any>>) dst(%58 : memref<256x256xf32, #tpu.memory_space<vmem>>)
    %c0_44 = arith.constant 0 : index
    %c0_45 = arith.constant 0 : index
    %c0_46 = arith.constant 0 : index
    %61 = vector.load %arg6[%c0_44, %c0_45, %c0_46] : memref<3x256x256xf32, #tpu.memory_space<vmem>>, vector<1x256x256xf32>
    %62 = vector.shape_cast %61 : vector<1x256x256xf32> to vector<256x256xf32>
    %cst_47 = arith.constant dense<0.000000e+00> : vector<8x256xf32>
    %63 = tpu.matmul %54, %62, %cst_47 {dimension_numbers = #tpu.dot_dimension_numbers<[1], [0], [0], [1], [0, 0, 1, 1], [], []>} : vector<8x256xf32>, vector<256x256xf32>, vector<8x256xf32> -> vector<8x256xf32>
    %64 = arith.mulf %63, %63 : vector<8x256xf32>
    %cst_48 = arith.constant dense<0.000000e+00> : vector<256xf32>
    %65 = vector.multi_reduction <add>, %63, %cst_48 [0] : vector<8x256xf32> to vector<256xf32>
    %66 = vector.shape_cast %65 : vector<256xf32> to vector<1x256xf32>
    %cst_49 = arith.constant 1.250000e-01 : f32
    %67 = vector.broadcast %cst_49 : f32 to vector<1x256xf32>
    %68 = arith.mulf %66, %67 : vector<1x256xf32>
    %cst_50 = arith.constant dense<0.000000e+00> : vector<256xf32>
    %69 = vector.multi_reduction <add>, %64, %cst_50 [0] : vector<8x256xf32> to vector<256xf32>
    %70 = vector.shape_cast %69 : vector<256xf32> to vector<1x256xf32>
    %cst_51 = arith.constant 1.250000e-01 : f32
    %71 = vector.broadcast %cst_51 : f32 to vector<1x256xf32>
    %72 = arith.mulf %70, %71 : vector<1x256xf32>
    %73 = arith.mulf %68, %68 : vector<1x256xf32>
    %74 = arith.subf %72, %73 : vector<1x256xf32>
    %cst_52 = arith.constant 9.99999974E-6 : f32
    %75 = vector.broadcast %cst_52 : f32 to vector<1x256xf32>
    %76 = arith.addf %74, %75 : vector<1x256xf32>
    %77 = math.rsqrt %76 : vector<1x256xf32>
    %78 = arith.mulf %23, %77 : vector<1x256xf32>
    %79 = arith.mulf %68, %78 : vector<1x256xf32>
    %80 = arith.subf %24, %79 : vector<1x256xf32>
    %81 = vector.broadcast %78 : vector<1x256xf32> to vector<8x256xf32>
    %82 = arith.mulf %63, %81 : vector<8x256xf32>
    %83 = vector.broadcast %80 : vector<1x256xf32> to vector<8x256xf32>
    %84 = arith.addf %82, %83 : vector<8x256xf32>
    %cst_53 = arith.constant 0.000000e+00 : f32
    %85 = vector.broadcast %cst_53 : f32 to vector<8x256xf32>
    %86 = arith.maximumf %84, %85 : vector<8x256xf32>
    %c1_i32_54 = arith.constant 1 : i32
    %c1_i32_55 = arith.constant 1 : i32
    %c1_i32_56 = arith.constant 1 : i32
    %c0_i32_57 = arith.constant 0 : i32
    %c0_i32_58 = arith.constant 0 : i32
    %87 = tpu.memref_slice %arg3[%c1_i32_54, %c0_i32_57, %c0_i32_58] : memref<3x256x256xf32, #tpu.memory_space<any>> -> memref<1x256x256xf32, #tpu.memory_space<any>>
    %88 = tpu.memref_squeeze %87 : memref<1x256x256xf32, #tpu.memory_space<any>> -> memref<256x256xf32, #tpu.memory_space<any>>
    %c0_i32_59 = arith.constant 0 : i32
    %c0_i32_60 = arith.constant 0 : i32
    %89 = tpu.memref_slice %arg6[%c1_i32_55, %c0_i32_59, %c0_i32_60] : memref<3x256x256xf32, #tpu.memory_space<vmem>> -> memref<1x256x256xf32, #tpu.memory_space<vmem>>
    %90 = tpu.memref_squeeze %89 : memref<1x256x256xf32, #tpu.memory_space<vmem>> -> memref<256x256xf32, #tpu.memory_space<vmem>>
    %91 = tpu.memref_slice %arg8[%c1_i32_56] : memref<4x!tpu.dma_semaphore, #tpu.memory_space<semaphore_mem>> -> memref<1x!tpu.dma_semaphore, #tpu.memory_space<semaphore_mem>>
    %92 = tpu.memref_squeeze %91 : memref<1x!tpu.dma_semaphore, #tpu.memory_space<semaphore_mem>> -> memref<!tpu.dma_semaphore, #tpu.memory_space<semaphore_mem>>
    tpu.wait_dma2 semaphore(%92 : memref<!tpu.dma_semaphore, #tpu.memory_space<semaphore_mem>>) src(%88 : memref<256x256xf32, #tpu.memory_space<any>>) dst(%90 : memref<256x256xf32, #tpu.memory_space<vmem>>)
    %c1_61 = arith.constant 1 : index
    %c0_62 = arith.constant 0 : index
    %c0_63 = arith.constant 0 : index
    %93 = vector.load %arg6[%c1_61, %c0_62, %c0_63] : memref<3x256x256xf32, #tpu.memory_space<vmem>>, vector<1x256x256xf32>
    %94 = vector.shape_cast %93 : vector<1x256x256xf32> to vector<256x256xf32>
    %cst_64 = arith.constant dense<0.000000e+00> : vector<8x256xf32>
    %95 = tpu.matmul %86, %94, %cst_64 {dimension_numbers = #tpu.dot_dimension_numbers<[1], [0], [0], [1], [0, 0, 1, 1], [], []>} : vector<8x256xf32>, vector<256x256xf32>, vector<8x256xf32> -> vector<8x256xf32>
    %96 = arith.mulf %95, %95 : vector<8x256xf32>
    %cst_65 = arith.constant dense<0.000000e+00> : vector<256xf32>
    %97 = vector.multi_reduction <add>, %95, %cst_65 [0] : vector<8x256xf32> to vector<256xf32>
    %98 = vector.shape_cast %97 : vector<256xf32> to vector<1x256xf32>
    %cst_66 = arith.constant 1.250000e-01 : f32
    %99 = vector.broadcast %cst_66 : f32 to vector<1x256xf32>
    %100 = arith.mulf %98, %99 : vector<1x256xf32>
    %cst_67 = arith.constant dense<0.000000e+00> : vector<256xf32>
    %101 = vector.multi_reduction <add>, %96, %cst_67 [0] : vector<8x256xf32> to vector<256xf32>
    %102 = vector.shape_cast %101 : vector<256xf32> to vector<1x256xf32>
    %cst_68 = arith.constant 1.250000e-01 : f32
    %103 = vector.broadcast %cst_68 : f32 to vector<1x256xf32>
    %104 = arith.mulf %102, %103 : vector<1x256xf32>
    %105 = arith.mulf %100, %100 : vector<1x256xf32>
    %106 = arith.subf %104, %105 : vector<1x256xf32>
    %cst_69 = arith.constant 9.99999974E-6 : f32
    %107 = vector.broadcast %cst_69 : f32 to vector<1x256xf32>
    %108 = arith.addf %106, %107 : vector<1x256xf32>
    %109 = math.rsqrt %108 : vector<1x256xf32>
    %110 = arith.mulf %25, %109 : vector<1x256xf32>
    %111 = arith.mulf %100, %110 : vector<1x256xf32>
    %112 = arith.subf %26, %111 : vector<1x256xf32>
    %113 = vector.broadcast %110 : vector<1x256xf32> to vector<8x256xf32>
    %114 = arith.mulf %95, %113 : vector<8x256xf32>
    %115 = vector.broadcast %112 : vector<1x256xf32> to vector<8x256xf32>
    %116 = arith.addf %114, %115 : vector<8x256xf32>
    %cst_70 = arith.constant 0.000000e+00 : f32
    %117 = vector.broadcast %cst_70 : f32 to vector<8x256xf32>
    %118 = arith.maximumf %116, %117 : vector<8x256xf32>
    %c2_i32_71 = arith.constant 2 : i32
    %c2_i32_72 = arith.constant 2 : i32
    %c2_i32_73 = arith.constant 2 : i32
    %c0_i32_74 = arith.constant 0 : i32
    %c0_i32_75 = arith.constant 0 : i32
    %119 = tpu.memref_slice %arg3[%c2_i32_71, %c0_i32_74, %c0_i32_75] : memref<3x256x256xf32, #tpu.memory_space<any>> -> memref<1x256x256xf32, #tpu.memory_space<any>>
    %120 = tpu.memref_squeeze %119 : memref<1x256x256xf32, #tpu.memory_space<any>> -> memref<256x256xf32, #tpu.memory_space<any>>
    %c0_i32_76 = arith.constant 0 : i32
    %c0_i32_77 = arith.constant 0 : i32
    %121 = tpu.memref_slice %arg6[%c2_i32_72, %c0_i32_76, %c0_i32_77] : memref<3x256x256xf32, #tpu.memory_space<vmem>> -> memref<1x256x256xf32, #tpu.memory_space<vmem>>
    %122 = tpu.memref_squeeze %121 : memref<1x256x256xf32, #tpu.memory_space<vmem>> -> memref<256x256xf32, #tpu.memory_space<vmem>>
    %123 = tpu.memref_slice %arg8[%c2_i32_73] : memref<4x!tpu.dma_semaphore, #tpu.memory_space<semaphore_mem>> -> memref<1x!tpu.dma_semaphore, #tpu.memory_space<semaphore_mem>>
    %124 = tpu.memref_squeeze %123 : memref<1x!tpu.dma_semaphore, #tpu.memory_space<semaphore_mem>> -> memref<!tpu.dma_semaphore, #tpu.memory_space<semaphore_mem>>
    tpu.wait_dma2 semaphore(%124 : memref<!tpu.dma_semaphore, #tpu.memory_space<semaphore_mem>>) src(%120 : memref<256x256xf32, #tpu.memory_space<any>>) dst(%122 : memref<256x256xf32, #tpu.memory_space<vmem>>)
    %c2_78 = arith.constant 2 : index
    %c0_79 = arith.constant 0 : index
    %c0_80 = arith.constant 0 : index
    %125 = vector.load %arg6[%c2_78, %c0_79, %c0_80] : memref<3x256x256xf32, #tpu.memory_space<vmem>>, vector<1x256x256xf32>
    %126 = vector.shape_cast %125 : vector<1x256x256xf32> to vector<256x256xf32>
    %cst_81 = arith.constant dense<0.000000e+00> : vector<8x256xf32>
    %127 = tpu.matmul %118, %126, %cst_81 {dimension_numbers = #tpu.dot_dimension_numbers<[1], [0], [0], [1], [0, 0, 1, 1], [], []>} : vector<8x256xf32>, vector<256x256xf32>, vector<8x256xf32> -> vector<8x256xf32>
    %128 = arith.mulf %127, %127 : vector<8x256xf32>
    %cst_82 = arith.constant dense<0.000000e+00> : vector<256xf32>
    %129 = vector.multi_reduction <add>, %127, %cst_82 [0] : vector<8x256xf32> to vector<256xf32>
    %130 = vector.shape_cast %129 : vector<256xf32> to vector<1x256xf32>
    %cst_83 = arith.constant 1.250000e-01 : f32
    %131 = vector.broadcast %cst_83 : f32 to vector<1x256xf32>
    %132 = arith.mulf %130, %131 : vector<1x256xf32>
    %cst_84 = arith.constant dense<0.000000e+00> : vector<256xf32>
    %133 = vector.multi_reduction <add>, %128, %cst_84 [0] : vector<8x256xf32> to vector<256xf32>
    %134 = vector.shape_cast %133 : vector<256xf32> to vector<1x256xf32>
    %cst_85 = arith.constant 1.250000e-01 : f32
    %135 = vector.broadcast %cst_85 : f32 to vector<1x256xf32>
    %136 = arith.mulf %134, %135 : vector<1x256xf32>
    %137 = arith.mulf %132, %132 : vector<1x256xf32>
    %138 = arith.subf %136, %137 : vector<1x256xf32>
    %cst_86 = arith.constant 9.99999974E-6 : f32
    %139 = vector.broadcast %cst_86 : f32 to vector<1x256xf32>
    %140 = arith.addf %138, %139 : vector<1x256xf32>
    %141 = math.rsqrt %140 : vector<1x256xf32>
    %142 = arith.mulf %27, %141 : vector<1x256xf32>
    %143 = arith.mulf %132, %142 : vector<1x256xf32>
    %144 = arith.subf %28, %143 : vector<1x256xf32>
    %145 = vector.broadcast %142 : vector<1x256xf32> to vector<8x256xf32>
    %146 = arith.mulf %127, %145 : vector<8x256xf32>
    %147 = vector.broadcast %144 : vector<1x256xf32> to vector<8x256xf32>
    %148 = arith.addf %146, %147 : vector<8x256xf32>
    %cst_87 = arith.constant 0.000000e+00 : f32
    %149 = vector.broadcast %cst_87 : f32 to vector<8x256xf32>
    %150 = arith.maximumf %148, %149 : vector<8x256xf32>
    %c3_i32_88 = arith.constant 3 : i32
    %151 = tpu.memref_slice %arg8[%c3_i32_88] : memref<4x!tpu.dma_semaphore, #tpu.memory_space<semaphore_mem>> -> memref<1x!tpu.dma_semaphore, #tpu.memory_space<semaphore_mem>>
    %152 = tpu.memref_squeeze %151 : memref<1x!tpu.dma_semaphore, #tpu.memory_space<semaphore_mem>> -> memref<!tpu.dma_semaphore, #tpu.memory_space<semaphore_mem>>
    tpu.wait_dma2 semaphore(%152 : memref<!tpu.dma_semaphore, #tpu.memory_space<semaphore_mem>>) src(%arg4 : memref<256x128xf32, #tpu.memory_space<any>>) dst(%arg7 : memref<256x128xf32, #tpu.memory_space<vmem>>)
    %c0_89 = arith.constant 0 : index
    %c0_90 = arith.constant 0 : index
    %153 = vector.load %arg7[%c0_89, %c0_90] : memref<256x128xf32, #tpu.memory_space<vmem>>, vector<256x128xf32>
    %cst_91 = arith.constant dense<0.000000e+00> : vector<8x128xf32>
    %154 = tpu.matmul %150, %153, %cst_91 {dimension_numbers = #tpu.dot_dimension_numbers<[1], [0], [0], [1], [0, 0, 1, 1], [], []>} : vector<8x256xf32>, vector<256x128xf32>, vector<8x128xf32> -> vector<8x128xf32>
    %155 = vector.broadcast %29 : vector<1x128xf32> to vector<8x128xf32>
    %156 = arith.addf %154, %155 : vector<8x128xf32>
    %c0_92 = arith.constant 0 : index
    %c0_93 = arith.constant 0 : index
    %157 = vector.load %arg5[%c0_92, %c0_93] : memref<8x128xf32, #tpu.memory_space<vmem>>, vector<8x128xf32>
    tpu.vector_store %arg5[%c0_92, %c0_93], %156 {strides = array<i32>} : memref<8x128xf32, #tpu.memory_space<vmem>>, vector<8x128xf32>,
    return
  }
}

</mosaic_0001>

<bundles_post_ra>
// kernel: bl_p2a_forward.1
= control target key start
LH: loop header
LB: loop body
LE: loop exit
PB: predicated region body
PF: predicated region fallthrough
CT: control target
= control target key end

     0   :  { %10 = vsyncpa [#allocation6], 0  ;;  %s1910_s0 = inlined_call_operand.hbm [shape: f32[8,9], index: 0, kind: input, shape index: {}]   ;;  %s1911_s1 = inlined_call_operand.hbm [shape: f32[9,256], index: 1, kind: input, shape index: {}]   ;;  %s1912_s2 = inlined_call_operand.hbm [shape: f32[9,256], index: 2, kind: input, shape index: {}]   ;;  %s1913_s3 = inlined_call_operand.hbm [shape: f32[3,256,256], index: 3, kind: input, shape index: {}]   ;;  %s1914_s4 = inlined_call_operand.hbm [shape: f32[256,128], index: 4, kind: input, shape index: {}]   ;;  %s1915_s5 = inlined_call_operand.vmem [shape: f32[8,128], index: 5, kind: output, shape index: {}]  }
   0x1   :  { %11 = vsyncpa [#allocation8], 0  ;;  %s1657_s18 = smov [#allocation7]   ;;  %s1485_s22 = scalar_lea.hbm %s1911_s1, 512 }
   0x2   :  { %s27_s19 = sshll.u32 %s1657_s18, 4  ;;  %p1486_p0 = scmp.ne.s32.totalorder %s1911_s1, %s1485_s22  ;;  %s28_s19 = int_to_ptr.vmem [resolvable:$true] %s27_s19 }
   0x3   :  { %p1489_p1 = scmp.lt.u32.totalorder %s1485_s22, %s1911_s1 }
   0x5   :  { %p1491_p2 = pnand %p1489_p1, %p1486_p0 }
   0x7   :  { %1494 = shalt.err (!%p1491_p2)
}
   0x8   :  { %s1495_s27 = scalar_lea.vmem %s28_s19, 512  ;;  %p1500_p4 = scmp.lt.s32.totalorder %s28_s19, %s28_s19 }
   0x9   :  { %p1496_p3 = scmp.ne.s32.totalorder %s28_s19, %s1495_s27  ;;  %p1501_p5 = scmp.lt.s32.totalorder %s1495_s27, %s1495_s27 }
   0xb   :  { %p1502_p6 = por %p1501_p5, %p1500_p4 }
   0xd   :  { %p1503_p7 = pnand %p1502_p6, %p1496_p3 }
   0xf   :  { %1506 = shalt.err (!%p1503_p7)
}
  0x10   :  { %s1658_s28 = smov 256   ;;  %s1659_s29 = smov 16  }
  0x11   :  { %33 = dma.hbm_to_vmem [thread:$0]  %s1911_s1, 512, %s28_s19, [#allocation8], %s1658_s28, %s1658_s28, %s1659_s29  }
  0x12   :  { %s1660_s7 = smov [#allocation5]   ;;  %s1661_s9 = smov [#allocation9]  }
  0x13   :  { %s18_s8 = sshll.u32 %s1660_s7, 4  ;;  %s39_s10 = sshll.u32 %s1661_s9, 4  ;;  %s19_s8 = int_to_ptr.vmem [resolvable:$true] %s18_s8  ;;  %s40_s10 = int_to_ptr.vmem [resolvable:$true] %s39_s10 }
  0x14   :  { %s1507_s13 = scalar_lea.hbm %s1910_s0, 128 }
  0x15   :  { %p1508_p8 = scmp.ne.s32.totalorder %s1910_s0, %s1507_s13  ;;  %p1511_p9 = scmp.lt.u32.totalorder %s1507_s13, %s1910_s0 }
  0x17   :  { %p1513_p10 = pnand %p1511_p9, %p1508_p8 }
  0x19   :  { %1516 = shalt.err (!%p1513_p10)
}
  0x1a   :  { %s1517_s1 = scalar_lea.vmem %s19_s8, 128  ;;  %p1522_p12 = scmp.lt.s32.totalorder %s19_s8, %s19_s8 }
  0x1b   :  { %p1518_p11 = scmp.ne.s32.totalorder %s19_s8, %s1517_s1  ;;  %p1523_p13 = scmp.lt.s32.totalorder %s1517_s1, %s1517_s1 }
  0x1d   :  { %p1524_p0 = por %p1523_p13, %p1522_p12 }
  0x1f   :  { %p1525_p1 = pnand %p1524_p0, %p1518_p11 }
  0x21   :  { %1528 = shalt.err (!%p1525_p1)
}
  0x22   :  { %21 = dma.hbm_to_vmem [thread:$0]  %s1910_s0, 128, %s19_s8, [#allocation6]  }
  0x23   :  { %s1529_s22 = scalar_lea.hbm %s1912_s2, 512 }
  0x24   :  { %p1530_p2 = scmp.ne.s32.totalorder %s1912_s2, %s1529_s22  ;;  %p1533_p3 = scmp.lt.u32.totalorder %s1529_s22, %s1912_s2 }
  0x26   :  { %p1535_p4 = pnand %p1533_p3, %p1530_p2 }
  0x28   :  { %1538 = shalt.err (!%p1535_p4)
}
  0x29   :  { %s1539_s27 = scalar_lea.vmem %s40_s10, 512  ;;  %p1544_p6 = scmp.lt.s32.totalorder %s40_s10, %s40_s10 }
  0x2a   :  { %p1540_p5 = scmp.ne.s32.totalorder %s40_s10, %s1539_s27  ;;  %p1545_p7 = scmp.lt.s32.totalorder %s1539_s27, %s1539_s27 }
  0x2c   :  { %p1546_p8 = por %p1545_p7, %p1544_p6 }
  0x2e   :  { %p1547_p9 = pnand %p1546_p8, %p1540_p5 }
  0x30   :  { %1550 = shalt.err (!%p1547_p9)
}
  0x31   :  { %45 = dma.hbm_to_vmem [thread:$0]  %s1912_s2, 512, %s40_s10, [#allocation8], %s1658_s28, %s1658_s28, %s1659_s29  }
  0x32   :  { %1645 = dma.done.wait [#allocation6], 128  }
  0x33   :  { %1646 = vsyncadd [#allocation6], 4294967168 }
  0x34   :  { %1647 = dma.done.wait [#allocation8], 1024  }
  0x35   :  { %1648 = vsyncadd [#allocation8], 4294966272  ;;  %v1662_v0 = vmov 0.0   ;;  %vm131_vm0 = vcmask 1040384   ;;  %vm1663_vm1 = vmmov 1   ;;  %v124_v8 = vld [vmem:[#allocation7 + $0x8] sm:$0xff] }
  0x36   :  { %202 = vmatprep.mubr.f32.mxu0 %v1662_v0  ;;  %v1741_v1 = vld [vmem:[#allocation9 + $0x2] ss:$8 sm:$0x3]  ;;  %v1743_v2 = vld [vmem:[#allocation9 + $0x3] ss:$8 sm:$0x3]  ;;  %vm1228_vm2 = vmpackc.low %vm131_vm0, %vm1663_vm1 }
  0x37   :  { %v1745_v3 = vld [vmem:[#allocation9 + $0x4] ss:$8 sm:$0x3]  ;;  %v1747_v4 = vld [vmem:[#allocation9 + $0x5] ss:$8 sm:$0x3] }
  0x38   :  { %v1749_v5 = vld [vmem:[#allocation9 + $0x6] ss:$8 sm:$0x3]  ;;  %v1751_v6 = vld [vmem:[#allocation9 + $0x7] ss:$8 sm:$0x3] }
  0x39   :  { %v1753_v7 = vld [vmem:[#allocation9 + $0x10] ss:$0 sm:$0xff]  ;;  %v126_v9 = vld [vmem:[#allocation7 + $0x18] sm:$0x1]  ;;  %v123_v11 = vld [vmem:[#allocation7] sm:$0xff]  ;;  %vm127_vm3 = vcmask 72704  }
  0x3a   :  { %v1227_v10 = vpack.c.bf16 %v126_v9, %v124_v8  ;;  %v125_v12 = vld [vmem:[#allocation7 + $0x10] sm:$0x1]  ;;  %v106_v14 = vld [vmem:[#allocation5] sm:$0xff]  ;;  %s1664_s2 = smov [#allocation2]   ;;  %s1665_s29 = smov [#allocation2 + $0x200]  }
  0x3b   :  { %v1230_v13 = vpack.c.bf16 %v125_v12, %v123_v11  ;;  %s62_s28 = sshll.u32 %s1664_s2, 4  ;;  %s76_s6 = sshll.u32 %s1665_s29, 4  ;;  %s1755_s28 = int_to_ptr.vmem [resolvable:$true] %s62_s28  ;;  %s77_s6 = int_to_ptr.vmem [resolvable:$true] %s76_s6 }
  0x3c   :  { %1229 = vmatprep.subr.msk.bf16.mxu0 %vm1228_vm2, %v1227_v10  ;;  %s1760_s9 = scalar_lea.hbm %s1913_s3, 8192  ;;  %s1769_s14 = scalar_lea.hbm %s1913_s3, 24576 }
  0x3d   :  { %1232 = vmatpush1.bf16.msk.msra.mxu0 %vm1228_vm2, %v1230_v13  ;;  %p1552_p10 = scmp.ne.s32.totalorder %s1913_s3, %s1760_s9  ;;  %p1554_p11 = scmp.lt.u32.totalorder %s1769_s14, %s1760_s9 }
  0x3e   :  { %p1555_p12 = scmp.lt.u32.totalorder %s1760_s9, %s1913_s3 }
  0x40   :  { %1187 = vmatmul.mubr.msk.f32.vlgmr.msra.gmra.mrb[0].mxu0 %vm127_vm3, %v106_v14  ;;  %p1556_p13 = por %p1555_p12, %p1554_p11 }
  0x42   :  { %p1557_p0 = pnand %p1556_p13, %p1552_p10 }
  0x44   :  { %1560 = shalt.err (!%p1557_p0)  }
  0x45   :  { %s1561_s18 = scalar_lea.vmem %s1755_s28, 8192  ;;  %s1785_s19 = scalar_lea.vmem %s1755_s28, 24576 }
  0x46   :  { %p1562_p1 = scmp.ne.s32.totalorder %s1755_s28, %s1561_s18  ;;  %p1566_p2 = scmp.lt.s32.totalorder %s1755_s28, %s1755_s28 }
  0x47   :  { %p1567_p3 = scmp.lt.s32.totalorder %s1785_s19, %s1561_s18 }
  0x49   :  { %p1568_p4 = por %p1567_p3, %p1566_p2 }
  0x4b   :  { %p1569_p5 = pnand %p1568_p4, %p1562_p1 }
  0x4d   :  { %1572 = shalt.err (!%p1569_p5)  }
  0x4e   :  { %65 = dma.hbm_to_vmem [thread:$0]  %s1913_s3, 8192, %s1755_s28, [#allocation4] }
  0x4f   :  { %s1797_s24 = scalar_lea.hbm %s1913_s3, 16384 }
  0x50   :  { %p1574_p6 = scmp.ne.s32.totalorder %s1760_s9, %s1797_s24  ;;  %p1577_p7 = scmp.lt.u32.totalorder %s1769_s14, %s1797_s24 }
  0x51   :  { %p1579_p9 = scmp.lt.u32.totalorder %s1797_s24, %s1760_s9 }
  0x52   :  { %p1578_p8 = por %p1577_p7, %p1555_p12 }
  0x54   :  { %p1580_p10 = por %p1579_p9, %p1578_p8 }
  0x56   :  { %p1581_p11 = pnand %p1580_p10, %p1574_p6 }
  0x58   :  { %1584 = shalt.err (!%p1581_p11)  }
  0x59   :  { %s1585_s27 = scalar_lea.vmem %s77_s6, 8192  ;;  %p1590_p0 = scmp.lt.s32.totalorder %s77_s6, %s1755_s28 }
  0x5a   :  { %p1586_p13 = scmp.ne.s32.totalorder %s77_s6, %s1585_s27  ;;  %p1591_p1 = scmp.lt.s32.totalorder %s1785_s19, %s1585_s27 }
  0x5c   :  { %p1592_p2 = por %p1591_p1, %p1590_p0 }
  0x5e   :  { %p1593_p3 = pnand %p1592_p2, %p1586_p13 }
  0x60   :  { %1596 = shalt.err (!%p1593_p3)  }
  0x61   :  { %79 = dma.hbm_to_vmem [thread:$0]  %s1760_s9, 8192, %s77_s6, [#allocation4 + $0x1] }
  0x62   :  { %s1666_s0 = smov [#allocation2 + $0x400]   ;;  %s1667_s2 = smov [#allocation3]  }
  0x63   :  { %s90_s30 = sshll.u32 %s1666_s0, 4  ;;  %s102_s29 = sshll.u32 %s1667_s2, 4  ;;  %s91_s30 = int_to_ptr.vmem [resolvable:$true] %s90_s30  ;;  %s103_s29 = int_to_ptr.vmem [resolvable:$true] %s102_s29 }
  0x64   :  { %p1599_p12 = scmp.ne.s32.totalorder %s1797_s24, %s1769_s14  ;;  %p1601_p4 = scmp.lt.u32.totalorder %s1797_s24, %s1913_s3 }
  0x65   :  { %p1602_p5 = scmp.lt.u32.totalorder %s1769_s14, %s1769_s14 }
  0x67   :  { %p1603_p6 = por %p1602_p5, %p1601_p4 }
  0x69   :  { %p1605_p8 = por %p1603_p6, %p1577_p7 }
  0x6b   :  { %p1606_p9 = pnand %p1605_p8, %p1599_p12 }
  0x6d   :  { %1609 = shalt.err (!%p1606_p9)  }
  0x6e   :  { %s1610_s10 = scalar_lea.vmem %s91_s30, 8192  ;;  %p1615_p11 = scmp.lt.s32.totalorder %s91_s30, %s1755_s28 }
  0x6f   :  { %p1611_p10 = scmp.ne.s32.totalorder %s91_s30, %s1610_s10  ;;  %p1616_p13 = scmp.lt.s32.totalorder %s1785_s19, %s1610_s10 }
  0x71   :  { %p1617_p0 = por %p1616_p13, %p1615_p11 }
  0x73   :  { %p1618_p1 = pnand %p1617_p0, %p1611_p10 }
  0x75   :  { %1621 = shalt.err (!%p1618_p1)  }
  0x76   :  { %93 = dma.hbm_to_vmem [thread:$0]  %s1797_s24, 8192, %s91_s30, [#allocation4 + $0x2] }
  0x77   :  { %s1623_s9 = scalar_lea.hbm %s1914_s4, 4096 }
  0x78   :  { %p1624_p7 = scmp.ne.s32.totalorder %s1914_s4, %s1623_s9  ;;  %p1627_p2 = scmp.lt.u32.totalorder %s1623_s9, %s1914_s4 }
  0x7a   :  { %p1629_p3 = pnand %p1627_p2, %p1624_p7 }
  0x7c   :  { %1632 = shalt.err (!%p1629_p3)  }
  0x7d   :  { %s1633_s28 = scalar_lea.vmem %s103_s29, 4096  ;;  %p1638_p4 = scmp.lt.s32.totalorder %s103_s29, %s103_s29 }
  0x7e   :  { %p1634_p12 = scmp.ne.s32.totalorder %s103_s29, %s1633_s28  ;;  %p1639_p5 = scmp.lt.s32.totalorder %s1633_s28, %s1633_s28 }
  0x80   :  { %p1640_p6 = por %p1639_p5, %p1638_p4 }
  0x82   :  { %p1641_p8 = pnand %p1640_p6, %p1634_p12 }
  0x84   :  { %1644 = shalt.err (!%p1641_p8)  }
  0x85   :  { %105 = dma.hbm_to_vmem [thread:$0]  %s1914_s4, 4096, %s103_s29, [#allocation4 + $0x3]  ;;  %v1668_v53 = vmov 1966171168   ;;  %v253_v55 = vlaneseq }
  0x86   :  { %v251_v54 = vunpack.c.l.s4 %v1668_v53  ;;  %v107_v63 = vld [vmem:[#allocation9] ss:$8 sm:$0x3] }
  0x87   :  { %v254_v57 = vshrl.u32 %v253_v55, 7 }
  0x88   :  { %v252_v56 = vunpack.c.0.s8 %v251_v54 }
  0x89   :  { %v1846_v8 = vsub.s32 0, %v254_v57  ;;  %v1848_v9 = vsub.s32 1, %v254_v57 }
  0x8a   :  { %v1842_v59 = vsub.s32 %v252_v56, %v254_v57 }
 0x113   :  { %v204_v15 = vpop.f32.mrb[0].mxu0 }
 0x114   :  { %v209_v16 = vmul.f32 %v204_v15, %v204_v15  ;;  %v211_v17 = vrot.slane %v204_v15, 4  ;;  %v206_v18 = vpop.f32.mrb[1].mxu0 }
 0x115   :  { %v210_v19 = vmul.f32 %v206_v18, %v206_v18  ;;  %v217_v20 = vrot.slane %v206_v18, 4 }
 0x116   :  { %v212_v21 = vadd.f32 %v211_v17, %v204_v15  ;;  %v225_v22 = vrot.slane %v209_v16, 4 }
 0x117   :  { %v218_v23 = vadd.f32 %v217_v20, %v206_v18  ;;  %v231_v24 = vrot.slane %v210_v19, 4 }
 0x118   :  { %v213_v25 = vrot.slane %v212_v21, 2  ;;  %v226_v26 = vadd.f32 %v225_v22, %v209_v16 }
 0x119   :  { %v219_v27 = vrot.slane %v218_v23, 2  ;;  %v232_v28 = vadd.f32 %v231_v24, %v210_v19 }
 0x11a   :  { %v214_v29 = vadd.f32 %v213_v25, %v212_v21  ;;  %v227_v30 = vrot.slane %v226_v26, 2  ;;  %v109_v21 = vld [vmem:[#allocation9 + $0x1] ss:$8 sm:$0x3] }
 0x11b   :  { %v220_v31 = vadd.f32 %v219_v27, %v218_v23  ;;  %v233_v32 = vrot.slane %v232_v28, 2 }
 0x11c   :  { %v215_v33 = vrot.slane %v214_v29, 1  ;;  %v228_v34 = vadd.f32 %v227_v30, %v226_v26 }
 0x11d   :  { %v221_v35 = vrot.slane %v220_v31, 1  ;;  %v234_v36 = vadd.f32 %v233_v32, %v232_v28 }
 0x11e   :  { %v216_v37 = vadd.f32 %v215_v33, %v214_v29  ;;  %v229_v38 = vrot.slane %v228_v34, 1 }
 0x11f   :  { %v222_v39 = vadd.f32 %v221_v35, %v220_v31  ;;  %v235_v40 = vrot.slane %v234_v36, 1 }
 0x120   :  { %v223_v41 = vmul.f32 0.125, %v216_v37  ;;  %v230_v42 = vadd.f32 %v229_v38, %v228_v34 }
 0x121   :  { %v224_v43 = vmul.f32 0.125, %v222_v39  ;;  %v236_v44 = vadd.f32 %v235_v40, %v234_v36 }
 0x122   :  { %v237_v45 = vmul.f32 0.125, %v230_v42  ;;  %v239_v46 = vmul.f32 %v223_v41, %v223_v41 }
 0x123   :  { %v238_v47 = vmul.f32 0.125, %v236_v44  ;;  %v240_v48 = vmul.f32 %v224_v43, %v224_v43 }
 0x124   :  { %v241_v49 = vsub.f32 %v237_v45, %v239_v46 }
 0x125   :  { %v242_v50 = vsub.f32 %v238_v47, %v240_v48 }
 0x126   :  { %v243_v51 = vadd.f32 1e-05, %v241_v49 }
 0x127   :  { %v244_v52 = vadd.f32 1e-05, %v242_v50 }
 0x128   :  { %1469 = vrsqrt.f32 %v243_v51 }
 0x129   :  { %1471 = vrsqrt.f32 %v244_v52 }
 0x132   :  { %v1470_v58 = vpop.eup %1469 }
 0x133   :  { %v1472_v60 = vpop.eup %1471 }
 0x134   :  { %v249_v61 = vcombine.low %v1470_v58, %v1472_v60 }
 0x136   :  { %v256_v62 = vrot.slane %v249_v61, %v1842_v59 }
 0x138   :  { %v263_v0 = vrot.slane %v256_v62, %v1842_v59 }
 0x13a   :  { %v265_v10 = vmul.f32 %v263_v0, %v107_v63 }
 0x13c   :  { %v270_v11 = vrot.slane %v265_v10, %v1846_v8  ;;  %v274_v12 = vrot.slane %v265_v10, %v1848_v9 }
 0x13e   :  { %v277_v13 = vmul.f32 %v270_v11, %v223_v41  ;;  %v278_v14 = vmul.f32 %v274_v12, %v224_v43  ;;  %v298_v16 = vmul.f32 %v270_v11, %v204_v15  ;;  %v299_v17 = vmul.f32 %v274_v12, %v206_v18 }
 0x140   :  { %v281_v19 = vcombine.low %v277_v13, %v278_v14 }
 0x142   :  { %v288_v20 = vrot.slane %v281_v19, %v1842_v59 }
 0x144   :  { %v295_v22 = vrot.slane %v288_v20, %v1842_v59 }
 0x146   :  { %v297_v23 = vsub.f32 %v109_v21, %v295_v22 }
 0x148   :  { %v304_v24 = vrot.slane %v297_v23, %v1846_v8  ;;  %v308_v25 = vrot.slane %v297_v23, %v1848_v9 }
 0x14a   :  { %v1856_v26 = vadd.f32 %v304_v24, %v298_v16  ;;  %v312_v27 = vadd.f32 %v308_v25, %v299_v17 }
 0x14c   :  { %v313_v28 = vmax.f32 %v1856_v26, 0.0  ;;  %v314_v29 = vmax.f32 %v312_v27, 0.0 }
 0x14d   :  { %1649 = dma.done.wait [#allocation4], 8192 }
 0x14e   :  { %1650 = vsyncadd [#allocation4], 4294959104  ;;  %447 = vmatprep.mubr.f32.mxu1 %v314_v29  ;;  %v320_v15 = vld [vmem:[#allocation2 + $0x8] sm:$0xff]  ;;  %v322_v18 = vld [vmem:[#allocation2 + $0x18] sm:$0xff] }
 0x14f   :  { %v319_v30 = vld [vmem:[#allocation2] sm:$0xff]  ;;  %v1233_v31 = vpack.c.bf16 %v322_v18, %v320_v15  ;;  %v321_v32 = vld [vmem:[#allocation2 + $0x10] sm:$0xff]  ;;  %v324_v33 = vld [vmem:[#allocation2 + $0x28] sm:$0xff] }
 0x150   :  { %v326_v34 = vld [vmem:[#allocation2 + $0x38] sm:$0xff]  ;;  %v1235_v35 = vpack.c.bf16 %v321_v32, %v319_v30  ;;  %v323_v37 = vld [vmem:[#allocation2 + $0x20] sm:$0xff]  ;;  %v325_v38 = vld [vmem:[#allocation2 + $0x30] sm:$0xff] }
 0x151   :  { %v1237_v36 = vpack.c.bf16 %v326_v34, %v324_v33  ;;  %v328_v39 = vld [vmem:[#allocation2 + $0x48] sm:$0xff]  ;;  %1234 = vmatprep.subr.bf16.mxu1 %v1233_v31  ;;  %v330_v40 = vld [vmem:[#allocation2 + $0x58] sm:$0xff]  ;;  %v1239_v41 = vpack.c.bf16 %v325_v38, %v323_v37  ;;  %v327_v43 = vld [vmem:[#allocation2 + $0x40] sm:$0xff] }
 0x152   :  { %1236 = vmatpush1.bf16.msra.mxu1 %v1235_v35  ;;  %v1241_v42 = vpack.c.bf16 %v330_v40, %v328_v39  ;;  %v329_v44 = vld [vmem:[#allocation2 + $0x50] sm:$0xff]  ;;  %v332_v45 = vld [vmem:[#allocation2 + $0x68] sm:$0xff]  ;;  %v334_v46 = vld [vmem:[#allocation2 + $0x78] sm:$0xff] }
 0x153   :  { %1238 = vmatprep.subr.bf16.mxu1 %v1237_v36  ;;  %v1243_v47 = vpack.c.bf16 %v329_v44, %v327_v43  ;;  %v1245_v48 = vpack.c.bf16 %v334_v46, %v332_v45  ;;  %v331_v49 = vld [vmem:[#allocation2 + $0x60] sm:$0xff]  ;;  %v333_v50 = vld [vmem:[#allocation2 + $0x70] sm:$0xff]  ;;  %v336_v51 = vld [vmem:[#allocation2 + $0x88] sm:$0xff] }
 0x154   :  { %v338_v52 = vld [vmem:[#allocation2 + $0x98] sm:$0xff]  ;;  %v1247_v53 = vpack.c.bf16 %v333_v50, %v331_v49  ;;  %v335_v55 = vld [vmem:[#allocation2 + $0x80] sm:$0xff]  ;;  %v337_v56 = vld [vmem:[#allocation2 + $0x90] sm:$0xff] }
 0x155   :  { %v1249_v54 = vpack.c.bf16 %v338_v52, %v336_v51  ;;  %v340_v57 = vld [vmem:[#allocation2 + $0xa8] sm:$0xff]  ;;  %v342_v58 = vld [vmem:[#allocation2 + $0xb8] sm:$0xff]  ;;  %v1251_v60 = vpack.c.bf16 %v337_v56, %v335_v55  ;;  %v339_v62 = vld [vmem:[#allocation2 + $0xa0] sm:$0xff] }
 0x156   :  { %1240 = vmatpush1.bf16.msra.mxu1 %v1239_v41  ;;  %v1253_v61 = vpack.c.bf16 %v342_v58, %v340_v57  ;;  %v341_v63 = vld [vmem:[#allocation2 + $0xb0] sm:$0xff]  ;;  %v344_v0 = vld [vmem:[#allocation2 + $0xc8] sm:$0xff]  ;;  %v346_v10 = vld [vmem:[#allocation2 + $0xd8] sm:$0xff] }
 0x157   :  { %1242 = vmatprep.subr.bf16.mxu1 %v1241_v42  ;;  %v1255_v11 = vpack.c.bf16 %v341_v63, %v339_v62  ;;  %v1257_v12 = vpack.c.bf16 %v346_v10, %v344_v0  ;;  %v343_v13 = vld [vmem:[#allocation2 + $0xc0] sm:$0xff]  ;;  %v345_v14 = vld [vmem:[#allocation2 + $0xd0] sm:$0xff]  ;;  %v348_v16 = vld [vmem:[#allocation2 + $0xe8] sm:$0xff] }
 0x158   :  { %v350_v17 = vld [vmem:[#allocation2 + $0xf8] sm:$0xff]  ;;  %v1259_v19 = vpack.c.bf16 %v345_v14, %v343_v13  ;;  %v347_v21 = vld [vmem:[#allocation2 + $0xe0] sm:$0xff]  ;;  %v349_v22 = vld [vmem:[#allocation2 + $0xf0] sm:$0xff] }
 0x159   :  { %v1261_v20 = vpack.c.bf16 %v350_v17, %v348_v16  ;;  %v352_v23 = vld [vmem:[#allocation2 + $0x108] sm:$0xff]  ;;  %v354_v24 = vld [vmem:[#allocation2 + $0x118] sm:$0xff]  ;;  %v1263_v25 = vpack.c.bf16 %v349_v22, %v347_v21  ;;  %v351_v29 = vld [vmem:[#allocation2 + $0x100] sm:$0xff] }
 0x15a   :  { %1244 = vmatpush1.bf16.msra.mxu1 %v1243_v47  ;;  %v1265_v27 = vpack.c.bf16 %v354_v24, %v352_v23  ;;  %v353_v15 = vld [vmem:[#allocation2 + $0x110] sm:$0xff]  ;;  %v356_v18 = vld [vmem:[#allocation2 + $0x128] sm:$0xff]  ;;  %v358_v30 = vld [vmem:[#allocation2 + $0x138] sm:$0xff] }
 0x15b   :  { %1246 = vmatprep.subr.bf16.mxu1 %v1245_v48  ;;  %v1267_v31 = vpack.c.bf16 %v353_v15, %v351_v29  ;;  %v1269_v32 = vpack.c.bf16 %v358_v30, %v356_v18  ;;  %v355_v33 = vld [vmem:[#allocation2 + $0x120] sm:$0xff]  ;;  %v357_v34 = vld [vmem:[#allocation2 + $0x130] sm:$0xff]  ;;  %v360_v35 = vld [vmem:[#allocation2 + $0x148] sm:$0xff] }
 0x15c   :  { %v362_v36 = vld [vmem:[#allocation2 + $0x158] sm:$0xff]  ;;  %v1271_v37 = vpack.c.bf16 %v357_v34, %v355_v33  ;;  %v359_v39 = vld [vmem:[#allocation2 + $0x140] sm:$0xff]  ;;  %v361_v40 = vld [vmem:[#allocation2 + $0x150] sm:$0xff] }
 0x15d   :  { %v1273_v38 = vpack.c.bf16 %v362_v36, %v360_v35  ;;  %v364_v41 = vld [vmem:[#allocation2 + $0x168] sm:$0xff]  ;;  %v366_v42 = vld [vmem:[#allocation2 + $0x178] sm:$0xff]  ;;  %v1275_v43 = vpack.c.bf16 %v361_v40, %v359_v39  ;;  %v363_v45 = vld [vmem:[#allocation2 + $0x160] sm:$0xff] }
 0x15e   :  { %1248 = vmatpush1.bf16.msra.mxu1 %v1247_v53  ;;  %v1277_v44 = vpack.c.bf16 %v366_v42, %v364_v41  ;;  %v365_v46 = vld [vmem:[#allocation2 + $0x170] sm:$0xff]  ;;  %v368_v47 = vld [vmem:[#allocation2 + $0x188] sm:$0xff]  ;;  %v370_v48 = vld [vmem:[#allocation2 + $0x198] sm:$0xff] }
 0x15f   :  { %1250 = vmatprep.subr.bf16.mxu1 %v1249_v54  ;;  %v1279_v49 = vpack.c.bf16 %v365_v46, %v363_v45  ;;  %v1281_v50 = vpack.c.bf16 %v370_v48, %v368_v47  ;;  %v367_v51 = vld [vmem:[#allocation2 + $0x180] sm:$0xff]  ;;  %v369_v52 = vld [vmem:[#allocation2 + $0x190] sm:$0xff]  ;;  %v372_v53 = vld [vmem:[#allocation2 + $0x1a8] sm:$0xff] }
 0x160   :  { %v374_v54 = vld [vmem:[#allocation2 + $0x1b8] sm:$0xff]  ;;  %v1283_v55 = vpack.c.bf16 %v369_v52, %v367_v51  ;;  %v371_v57 = vld [vmem:[#allocation2 + $0x1a0] sm:$0xff]  ;;  %v373_v58 = vld [vmem:[#allocation2 + $0x1b0] sm:$0xff] }
 0x161   :  { %v1285_v56 = vpack.c.bf16 %v374_v54, %v372_v53  ;;  %v1287_v62 = vpack.c.bf16 %v373_v58, %v371_v57  ;;  %v375_v0 = vld [vmem:[#allocation2 + $0x1c0] sm:$0xff]  ;;  %v377_v10 = vld [vmem:[#allocation2 + $0x1d0] sm:$0xff] }
 0x162   :  { %1252 = vmatpush1.bf16.msra.mxu1 %v1251_v60  ;;  %v376_v60 = vld [vmem:[#allocation2 + $0x1c8] sm:$0xff]  ;;  %v1291_v13 = vpack.c.bf16 %v377_v10, %v375_v0  ;;  %v379_v16 = vld [vmem:[#allocation2 + $0x1e0] sm:$0xff]  ;;  %v381_v17 = vld [vmem:[#allocation2 + $0x1f0] sm:$0xff] }
 0x163   :  { %1254 = vmatprep.subr.bf16.mxu1 %v1253_v61  ;;  %v378_v61 = vld [vmem:[#allocation2 + $0x1d8] sm:$0xff] }
 0x164   :  { %v1289_v63 = vpack.c.bf16 %v378_v61, %v376_v60 }
 0x166   :  { %1256 = vmatpush1.bf16.msra.mxu1 %v1255_v11  ;;  %v380_v11 = vld [vmem:[#allocation2 + $0x1e8] sm:$0xff] }
 0x167   :  { %1258 = vmatprep.subr.bf16.mxu1 %v1257_v12  ;;  %v382_v12 = vld [vmem:[#allocation2 + $0x1f8] sm:$0xff] }
 0x168   :  { %v1293_v14 = vpack.c.bf16 %v382_v12, %v380_v11 }
 0x16a   :  { %1260 = vmatpush1.bf16.msra.mxu1 %v1259_v19  ;;  %v1295_v19 = vpack.c.bf16 %v381_v17, %v379_v16 }
 0x16b   :  { %1262 = vmatprep.subr.bf16.mxu1 %v1261_v20 }
 0x16e   :  { %1264 = vmatpush1.bf16.msra.mxu1 %v1263_v25 }
 0x16f   :  { %1266 = vmatprep.subr.bf16.mxu1 %v1265_v27 }
 0x172   :  { %1268 = vmatpush1.bf16.msra.mxu1 %v1267_v31 }
 0x173   :  { %1270 = vmatprep.subr.bf16.mxu1 %v1269_v32 }
 0x176   :  { %1272 = vmatpush1.bf16.msra.mxu1 %v1271_v37 }
 0x177   :  { %1274 = vmatprep.subr.bf16.mxu1 %v1273_v38 }
 0x17a   :  { %1276 = vmatpush1.bf16.msra.mxu1 %v1275_v43 }
 0x17b   :  { %1278 = vmatprep.subr.bf16.mxu1 %v1277_v44 }
 0x17e   :  { %1280 = vmatpush1.bf16.msra.mxu1 %v1279_v49 }
 0x17f   :  { %1282 = vmatprep.subr.bf16.mxu1 %v1281_v50 }
 0x182   :  { %1284 = vmatpush1.bf16.msra.mxu1 %v1283_v55 }
 0x183   :  { %1286 = vmatprep.subr.bf16.mxu1 %v1285_v56 }
 0x186   :  { %1288 = vmatpush1.bf16.msra.mxu1 %v1287_v62 }
 0x187   :  { %1290 = vmatprep.subr.bf16.mxu1 %v1289_v63 }
 0x18a   :  { %1292 = vmatpush1.bf16.msra.mxu1 %v1291_v13 }
 0x18b   :  { %1294 = vmatprep.subr.bf16.mxu1 %v1293_v14 }
 0x18e   :  { %1296 = vmatpush1.bf16.msra.mxu1 %v1295_v19 }
 0x191   :  { %448 = vmatmul.mubr.f32.vlgmr.msra.gmra.mrb[0].mxu1 %v313_v28 }
 0x264   :  { %v449_v20 = vpop.f32.mrb[0].mxu1 }
 0x265   :  { %v454_v21 = vmul.f32 %v449_v20, %v449_v20  ;;  %v456_v22 = vrot.slane %v449_v20, 4  ;;  %v451_v23 = vpop.f32.mrb[1].mxu1 }
 0x266   :  { %v455_v24 = vmul.f32 %v451_v23, %v451_v23  ;;  %v462_v25 = vrot.slane %v451_v23, 4 }
 0x267   :  { %v457_v27 = vadd.f32 %v456_v22, %v449_v20  ;;  %v470_v29 = vrot.slane %v454_v21, 4 }
 0x268   :  { %v463_v15 = vadd.f32 %v462_v25, %v451_v23  ;;  %v476_v18 = vrot.slane %v455_v24, 4 }
 0x269   :  { %v458_v30 = vrot.slane %v457_v27, 2  ;;  %v471_v31 = vadd.f32 %v470_v29, %v454_v21 }
 0x26a   :  { %v464_v32 = vrot.slane %v463_v15, 2  ;;  %v477_v33 = vadd.f32 %v476_v18, %v455_v24 }
 0x26b   :  { %v459_v34 = vadd.f32 %v458_v30, %v457_v27  ;;  %v472_v35 = vrot.slane %v471_v31, 2 }
 0x26c   :  { %v465_v36 = vadd.f32 %v464_v32, %v463_v15  ;;  %v478_v37 = vrot.slane %v477_v33, 2 }
 0x26d   :  { %v460_v26 = vrot.slane %v459_v34, 1  ;;  %v473_v28 = vadd.f32 %v472_v35, %v471_v31 }
 0x26e   :  { %v466_v38 = vrot.slane %v465_v36, 1  ;;  %v479_v39 = vadd.f32 %v478_v37, %v477_v33 }
 0x26f   :  { %v461_v40 = vadd.f32 %v460_v26, %v459_v34  ;;  %v474_v41 = vrot.slane %v473_v28, 1 }
 0x270   :  { %v467_v42 = vadd.f32 %v466_v38, %v465_v36  ;;  %v480_v43 = vrot.slane %v479_v39, 1 }
 0x271   :  { %v468_v44 = vmul.f32 0.125, %v461_v40  ;;  %v475_v45 = vadd.f32 %v474_v41, %v473_v28 }
 0x272   :  { %v469_v46 = vmul.f32 0.125, %v467_v42  ;;  %v481_v47 = vadd.f32 %v480_v43, %v479_v39 }
 0x273   :  { %v482_v48 = vmul.f32 0.125, %v475_v45  ;;  %v484_v49 = vmul.f32 %v468_v44, %v468_v44 }
 0x274   :  { %v483_v50 = vmul.f32 0.125, %v481_v47  ;;  %v485_v51 = vmul.f32 %v469_v46, %v469_v46 }
 0x275   :  { %v486_v52 = vsub.f32 %v482_v48, %v484_v49 }
 0x276   :  { %v487_v53 = vsub.f32 %v483_v50, %v485_v51 }
 0x277   :  { %v488_v54 = vadd.f32 1e-05, %v486_v52 }
 0x278   :  { %v489_v55 = vadd.f32 1e-05, %v487_v53 }
 0x279   :  { %1473 = vrsqrt.f32 %v488_v54 }
 0x27a   :  { %1475 = vrsqrt.f32 %v489_v55 }
 0x283   :  { %v1474_v56 = vpop.eup %1473 }
 0x284   :  { %v1476_v57 = vpop.eup %1475 }
 0x285   :  { %v494_v58 = vcombine.low %v1474_v56, %v1476_v57 }
 0x287   :  { %v501_v60 = vrot.slane %v494_v58, %v1842_v59 }
 0x289   :  { %v508_v61 = vrot.slane %v501_v60, %v1842_v59 }
 0x28b   :  { %v510_v62 = vmul.f32 %v508_v61, %v1741_v1 }
 0x28d   :  { %v515_v63 = vrot.slane %v510_v62, %v1846_v8  ;;  %v519_v0 = vrot.slane %v510_v62, %v1848_v9 }
 0x28f   :  { %v522_v10 = vmul.f32 %v515_v63, %v468_v44  ;;  %v523_v11 = vmul.f32 %v519_v0, %v469_v46  ;;  %v543_v12 = vmul.f32 %v515_v63, %v449_v20  ;;  %v544_v13 = vmul.f32 %v519_v0, %v451_v23 }
 0x291   :  { %v526_v14 = vcombine.low %v522_v10, %v523_v11 }
 0x293   :  { %v533_v16 = vrot.slane %v526_v14, %v1842_v59 }
 0x295   :  { %v540_v17 = vrot.slane %v533_v16, %v1842_v59 }
 0x297   :  { %v542_v19 = vsub.f32 %v1743_v2, %v540_v17 }
 0x299   :  { %v549_v21 = vrot.slane %v542_v19, %v1846_v8  ;;  %v553_v22 = vrot.slane %v542_v19, %v1848_v9 }
 0x29b   :  { %v1871_v1 = vadd.f32 %v549_v21, %v543_v12  ;;  %v557_v24 = vadd.f32 %v553_v22, %v544_v13 }
 0x29d   :  { %v558_v25 = vmax.f32 %v1871_v1, 0.0  ;;  %v559_v27 = vmax.f32 %v557_v24, 0.0 }
 0x29e   :  { %1651 = dma.done.wait [#allocation4 + $0x1], 8192 }
 0x29f   :  { %1652 = vsyncadd [#allocation4 + $0x1], 4294959104  ;;  %690 = vmatprep.mubr.f32.mxu0 %v559_v27  ;;  %v563_v20 = vld [vmem:[#allocation2 + $0x208] sm:$0xff]  ;;  %v565_v23 = vld [vmem:[#allocation2 + $0x218] sm:$0xff] }
 0x2a0   :  { %v562_v29 = vld [vmem:[#allocation2 + $0x200] sm:$0xff]  ;;  %v1297_v15 = vpack.c.bf16 %v565_v23, %v563_v20  ;;  %v564_v18 = vld [vmem:[#allocation2 + $0x210] sm:$0xff]  ;;  %v567_v30 = vld [vmem:[#allocation2 + $0x228] sm:$0xff] }
 0x2a1   :  { %v569_v2 = vld [vmem:[#allocation2 + $0x238] sm:$0xff]  ;;  %v1299_v31 = vpack.c.bf16 %v564_v18, %v562_v29  ;;  %v566_v33 = vld [vmem:[#allocation2 + $0x220] sm:$0xff]  ;;  %v568_v34 = vld [vmem:[#allocation2 + $0x230] sm:$0xff] }
 0x2a2   :  { %v1301_v32 = vpack.c.bf16 %v569_v2, %v567_v30  ;;  %v571_v35 = vld [vmem:[#allocation2 + $0x248] sm:$0xff]  ;;  %1298 = vmatprep.subr.bf16.mxu0 %v1297_v15  ;;  %v573_v36 = vld [vmem:[#allocation2 + $0x258] sm:$0xff]  ;;  %v1303_v37 = vpack.c.bf16 %v568_v34, %v566_v33  ;;  %v570_v28 = vld [vmem:[#allocation2 + $0x240] sm:$0xff] }
 0x2a3   :  { %1300 = vmatpush1.bf16.msra.mxu0 %v1299_v31  ;;  %v1305_v26 = vpack.c.bf16 %v573_v36, %v571_v35  ;;  %v572_v38 = vld [vmem:[#allocation2 + $0x250] sm:$0xff]  ;;  %v575_v39 = vld [vmem:[#allocation2 + $0x268] sm:$0xff]  ;;  %v577_v40 = vld [vmem:[#allocation2 + $0x278] sm:$0xff] }
 0x2a4   :  { %1302 = vmatprep.subr.bf16.mxu0 %v1301_v32  ;;  %v1307_v41 = vpack.c.bf16 %v572_v38, %v570_v28  ;;  %v1309_v42 = vpack.c.bf16 %v577_v40, %v575_v39  ;;  %v574_v43 = vld [vmem:[#allocation2 + $0x260] sm:$0xff]  ;;  %v576_v44 = vld [vmem:[#allocation2 + $0x270] sm:$0xff]  ;;  %v579_v45 = vld [vmem:[#allocation2 + $0x288] sm:$0xff] }
 0x2a5   :  { %v581_v46 = vld [vmem:[#allocation2 + $0x298] sm:$0xff]  ;;  %v1311_v47 = vpack.c.bf16 %v576_v44, %v574_v43  ;;  %v578_v49 = vld [vmem:[#allocation2 + $0x280] sm:$0xff]  ;;  %v580_v50 = vld [vmem:[#allocation2 + $0x290] sm:$0xff] }
 0x2a6   :  { %v1313_v48 = vpack.c.bf16 %v581_v46, %v579_v45  ;;  %v583_v51 = vld [vmem:[#allocation2 + $0x2a8] sm:$0xff]  ;;  %v585_v52 = vld [vmem:[#allocation2 + $0x2b8] sm:$0xff]  ;;  %v1315_v53 = vpack.c.bf16 %v580_v50, %v578_v49  ;;  %v582_v55 = vld [vmem:[#allocation2 + $0x2a0] sm:$0xff] }
 0x2a7   :  { %1304 = vmatpush1.bf16.msra.mxu0 %v1303_v37  ;;  %v1317_v54 = vpack.c.bf16 %v585_v52, %v583_v51  ;;  %v584_v56 = vld [vmem:[#allocation2 + $0x2b0] sm:$0xff]  ;;  %v587_v57 = vld [vmem:[#allocation2 + $0x2c8] sm:$0xff]  ;;  %v589_v58 = vld [vmem:[#allocation2 + $0x2d8] sm:$0xff] }
 0x2a8   :  { %1306 = vmatprep.subr.bf16.mxu0 %v1305_v26  ;;  %v1319_v60 = vpack.c.bf16 %v584_v56, %v582_v55  ;;  %v1321_v61 = vpack.c.bf16 %v589_v58, %v587_v57  ;;  %v586_v62 = vld [vmem:[#allocation2 + $0x2c0] sm:$0xff]  ;;  %v588_v63 = vld [vmem:[#allocation2 + $0x2d0] sm:$0xff]  ;;  %v591_v0 = vld [vmem:[#allocation2 + $0x2e8] sm:$0xff] }
 0x2a9   :  { %v593_v10 = vld [vmem:[#allocation2 + $0x2f8] sm:$0xff]  ;;  %v1323_v11 = vpack.c.bf16 %v588_v63, %v586_v62  ;;  %v590_v13 = vld [vmem:[#allocation2 + $0x2e0] sm:$0xff]  ;;  %v592_v14 = vld [vmem:[#allocation2 + $0x2f0] sm:$0xff] }
 0x2aa   :  { %v1325_v12 = vpack.c.bf16 %v593_v10, %v591_v0  ;;  %v595_v16 = vld [vmem:[#allocation2 + $0x308] sm:$0xff]  ;;  %v597_v17 = vld [vmem:[#allocation2 + $0x318] sm:$0xff]  ;;  %v1327_v19 = vpack.c.bf16 %v592_v14, %v590_v13  ;;  %v594_v22 = vld [vmem:[#allocation2 + $0x300] sm:$0xff] }
 0x2ab   :  { %1308 = vmatpush1.bf16.msra.mxu0 %v1307_v41  ;;  %v1329_v21 = vpack.c.bf16 %v597_v17, %v595_v16  ;;  %v596_v24 = vld [vmem:[#allocation2 + $0x310] sm:$0xff]  ;;  %v599_v27 = vld [vmem:[#allocation2 + $0x328] sm:$0xff]  ;;  %v601_v20 = vld [vmem:[#allocation2 + $0x338] sm:$0xff] }
 0x2ac   :  { %1310 = vmatprep.subr.bf16.mxu0 %v1309_v42  ;;  %v1331_v23 = vpack.c.bf16 %v596_v24, %v594_v22  ;;  %v1333_v29 = vpack.c.bf16 %v601_v20, %v599_v27  ;;  %v598_v15 = vld [vmem:[#allocation2 + $0x320] sm:$0xff]  ;;  %v600_v18 = vld [vmem:[#allocation2 + $0x330] sm:$0xff]  ;;  %v603_v30 = vld [vmem:[#allocation2 + $0x348] sm:$0xff] }
 0x2ad   :  { %v605_v2 = vld [vmem:[#allocation2 + $0x358] sm:$0xff]  ;;  %v1335_v31 = vpack.c.bf16 %v600_v18, %v598_v15  ;;  %v602_v33 = vld [vmem:[#allocation2 + $0x340] sm:$0xff]  ;;  %v604_v34 = vld [vmem:[#allocation2 + $0x350] sm:$0xff] }
 0x2ae   :  { %v1337_v32 = vpack.c.bf16 %v605_v2, %v603_v30  ;;  %v607_v35 = vld [vmem:[#allocation2 + $0x368] sm:$0xff]  ;;  %v609_v36 = vld [vmem:[#allocation2 + $0x378] sm:$0xff]  ;;  %v1339_v37 = vpack.c.bf16 %v604_v34, %v602_v33  ;;  %v606_v28 = vld [vmem:[#allocation2 + $0x360] sm:$0xff] }
 0x2af   :  { %1312 = vmatpush1.bf16.msra.mxu0 %v1311_v47  ;;  %v1341_v26 = vpack.c.bf16 %v609_v36, %v607_v35  ;;  %v608_v38 = vld [vmem:[#allocation2 + $0x370] sm:$0xff]  ;;  %v611_v39 = vld [vmem:[#allocation2 + $0x388] sm:$0xff]  ;;  %v613_v40 = vld [vmem:[#allocation2 + $0x398] sm:$0xff] }
 0x2b0   :  { %1314 = vmatprep.subr.bf16.mxu0 %v1313_v48  ;;  %v1343_v41 = vpack.c.bf16 %v608_v38, %v606_v28  ;;  %v1345_v42 = vpack.c.bf16 %v613_v40, %v611_v39  ;;  %v610_v43 = vld [vmem:[#allocation2 + $0x380] sm:$0xff]  ;;  %v612_v44 = vld [vmem:[#allocation2 + $0x390] sm:$0xff]  ;;  %v615_v45 = vld [vmem:[#allocation2 + $0x3a8] sm:$0xff] }
 0x2b1   :  { %v617_v46 = vld [vmem:[#allocation2 + $0x3b8] sm:$0xff]  ;;  %v1347_v47 = vpack.c.bf16 %v612_v44, %v610_v43  ;;  %v614_v49 = vld [vmem:[#allocation2 + $0x3a0] sm:$0xff]  ;;  %v616_v50 = vld [vmem:[#allocation2 + $0x3b0] sm:$0xff] }
 0x2b2   :  { %v1349_v48 = vpack.c.bf16 %v617_v46, %v615_v45  ;;  %v619_v51 = vld [vmem:[#allocation2 + $0x3c8] sm:$0xff]  ;;  %v621_v52 = vld [vmem:[#allocation2 + $0x3d8] sm:$0xff]  ;;  %v618_v55 = vld [vmem:[#allocation2 + $0x3c0] sm:$0xff] }
 0x2b3   :  { %1316 = vmatpush1.bf16.msra.mxu0 %v1315_v53  ;;  %v1351_v53 = vpack.c.bf16 %v616_v50, %v614_v49  ;;  %v620_v56 = vld [vmem:[#allocation2 + $0x3d0] sm:$0xff]  ;;  %v623_v57 = vld [vmem:[#allocation2 + $0x3e8] sm:$0xff]  ;;  %v625_v58 = vld [vmem:[#allocation2 + $0x3f8] sm:$0xff] }
 0x2b4   :  { %1318 = vmatprep.subr.bf16.mxu0 %v1317_v54  ;;  %v1353_v54 = vpack.c.bf16 %v621_v52, %v619_v51  ;;  %v622_v62 = vld [vmem:[#allocation2 + $0x3e0] sm:$0xff]  ;;  %v624_v63 = vld [vmem:[#allocation2 + $0x3f0] sm:$0xff] }
 0x2b5   :  { %v1359_v0 = vpack.c.bf16 %v624_v63, %v622_v62 }
 0x2b7   :  { %1320 = vmatpush1.bf16.msra.mxu0 %v1319_v60  ;;  %v1355_v60 = vpack.c.bf16 %v620_v56, %v618_v55 }
 0x2b8   :  { %1322 = vmatprep.subr.bf16.mxu0 %v1321_v61  ;;  %v1357_v61 = vpack.c.bf16 %v625_v58, %v623_v57 }
 0x2bb   :  { %1324 = vmatpush1.bf16.msra.mxu0 %v1323_v11 }
 0x2bc   :  { %1326 = vmatprep.subr.bf16.mxu0 %v1325_v12 }
 0x2bf   :  { %1328 = vmatpush1.bf16.msra.mxu0 %v1327_v19 }
 0x2c0   :  { %1330 = vmatprep.subr.bf16.mxu0 %v1329_v21 }
 0x2c3   :  { %1332 = vmatpush1.bf16.msra.mxu0 %v1331_v23 }
 0x2c4   :  { %1334 = vmatprep.subr.bf16.mxu0 %v1333_v29 }
 0x2c7   :  { %1336 = vmatpush1.bf16.msra.mxu0 %v1335_v31 }
 0x2c8   :  { %1338 = vmatprep.subr.bf16.mxu0 %v1337_v32 }
 0x2cb   :  { %1340 = vmatpush1.bf16.msra.mxu0 %v1339_v37 }
 0x2cc   :  { %1342 = vmatprep.subr.bf16.mxu0 %v1341_v26 }
 0x2cf   :  { %1344 = vmatpush1.bf16.msra.mxu0 %v1343_v41 }
 0x2d0   :  { %1346 = vmatprep.subr.bf16.mxu0 %v1345_v42 }
 0x2d3   :  { %1348 = vmatpush1.bf16.msra.mxu0 %v1347_v47 }
 0x2d4   :  { %1350 = vmatprep.subr.bf16.mxu0 %v1349_v48 }
 0x2d7   :  { %1352 = vmatpush1.bf16.msra.mxu0 %v1351_v53 }
 0x2d8   :  { %1354 = vmatprep.subr.bf16.mxu0 %v1353_v54 }
 0x2db   :  { %1356 = vmatpush1.bf16.msra.mxu0 %v1355_v60 }
 0x2dc   :  { %1358 = vmatprep.subr.bf16.mxu0 %v1357_v61 }
 0x2df   :  { %1360 = vmatpush1.bf16.msra.mxu0 %v1359_v0 }
 0x2e2   :  { %691 = vmatmul.mubr.f32.vlgmr.msra.gmra.mrb[2].mxu0 %v558_v25 }
 0x3b5   :  { %v692_v10 = vpop.f32.mrb[2].mxu0 }
 0x3b6   :  { %v697_v11 = vmul.f32 %v692_v10, %v692_v10  ;;  %v699_v12 = vrot.slane %v692_v10, 4  ;;  %v694_v13 = vpop.f32.mrb[3].mxu0 }
 0x3b7   :  { %v698_v14 = vmul.f32 %v694_v13, %v694_v13  ;;  %v705_v16 = vrot.slane %v694_v13, 4 }
 0x3b8   :  { %v700_v17 = vadd.f32 %v699_v12, %v692_v10  ;;  %v713_v19 = vrot.slane %v697_v11, 4 }
 0x3b9   :  { %v706_v21 = vadd.f32 %v705_v16, %v694_v13  ;;  %v719_v22 = vrot.slane %v698_v14, 4 }
 0x3ba   :  { %v701_v24 = vrot.slane %v700_v17, 2  ;;  %v714_v27 = vadd.f32 %v713_v19, %v697_v11 }
 0x3bb   :  { %v707_v20 = vrot.slane %v706_v21, 2  ;;  %v720_v23 = vadd.f32 %v719_v22, %v698_v14 }
 0x3bc   :  { %v702_v29 = vadd.f32 %v701_v24, %v700_v17  ;;  %v715_v15 = vrot.slane %v714_v27, 2 }
 0x3bd   :  { %v708_v18 = vadd.f32 %v707_v20, %v706_v21  ;;  %v721_v30 = vrot.slane %v720_v23, 2 }
 0x3be   :  { %v703_v1 = vrot.slane %v702_v29, 1  ;;  %v716_v25 = vadd.f32 %v715_v15, %v714_v27 }
 0x3bf   :  { %v709_v2 = vrot.slane %v708_v18, 1  ;;  %v722_v31 = vadd.f32 %v721_v30, %v720_v23 }
 0x3c0   :  { %v704_v32 = vadd.f32 %v703_v1, %v702_v29  ;;  %v717_v33 = vrot.slane %v716_v25, 1 }
 0x3c1   :  { %v710_v34 = vadd.f32 %v709_v2, %v708_v18  ;;  %v723_v35 = vrot.slane %v722_v31, 1 }
 0x3c2   :  { %v711_v36 = vmul.f32 0.125, %v704_v32  ;;  %v718_v37 = vadd.f32 %v717_v33, %v716_v25 }
 0x3c3   :  { %v712_v26 = vmul.f32 0.125, %v710_v34  ;;  %v724_v28 = vadd.f32 %v723_v35, %v722_v31 }
 0x3c4   :  { %v725_v38 = vmul.f32 0.125, %v718_v37  ;;  %v727_v39 = vmul.f32 %v711_v36, %v711_v36 }
 0x3c5   :  { %v726_v40 = vmul.f32 0.125, %v724_v28  ;;  %v728_v41 = vmul.f32 %v712_v26, %v712_v26 }
 0x3c6   :  { %v729_v42 = vsub.f32 %v725_v38, %v727_v39 }
 0x3c7   :  { %v730_v43 = vsub.f32 %v726_v40, %v728_v41 }
 0x3c8   :  { %v731_v44 = vadd.f32 1e-05, %v729_v42 }
 0x3c9   :  { %v732_v45 = vadd.f32 1e-05, %v730_v43 }
 0x3ca   :  { %1477 = vrsqrt.f32 %v731_v44 }
 0x3cb   :  { %1479 = vrsqrt.f32 %v732_v45 }
 0x3d4   :  { %v1478_v46 = vpop.eup %1477 }
 0x3d5   :  { %v1480_v47 = vpop.eup %1479 }
 0x3d6   :  { %v737_v48 = vcombine.low %v1478_v46, %v1480_v47 }
 0x3d8   :  { %v744_v49 = vrot.slane %v737_v48, %v1842_v59 }
 0x3da   :  { %v751_v50 = vrot.slane %v744_v49, %v1842_v59 }
 0x3dc   :  { %v753_v51 = vmul.f32 %v751_v50, %v1745_v3 }
 0x3de   :  { %v758_v52 = vrot.slane %v753_v51, %v1846_v8  ;;  %v762_v53 = vrot.slane %v753_v51, %v1848_v9 }
 0x3e0   :  { %v765_v54 = vmul.f32 %v758_v52, %v711_v36  ;;  %v766_v55 = vmul.f32 %v762_v53, %v712_v26  ;;  %v786_v56 = vmul.f32 %v758_v52, %v692_v10  ;;  %v787_v57 = vmul.f32 %v762_v53, %v694_v13 }
 0x3e2   :  { %v769_v58 = vcombine.low %v765_v54, %v766_v55 }
 0x3e4   :  { %v776_v60 = vrot.slane %v769_v58, %v1842_v59 }
 0x3e6   :  { %v783_v61 = vrot.slane %v776_v60, %v1842_v59 }
 0x3e8   :  { %v785_v62 = vsub.f32 %v1747_v4, %v783_v61 }
 0x3ea   :  { %v792_v63 = vrot.slane %v785_v62, %v1846_v8  ;;  %v796_v0 = vrot.slane %v785_v62, %v1848_v9 }
 0x3ec   :  { %v1886_v3 = vadd.f32 %v792_v63, %v786_v56  ;;  %v800_v11 = vadd.f32 %v796_v0, %v787_v57 }
 0x3ee   :  { %v801_v12 = vmax.f32 %v1886_v3, 0.0  ;;  %v802_v14 = vmax.f32 %v800_v11, 0.0 }
 0x3ef   :  { %1653 = dma.done.wait [#allocation4 + $0x2], 8192 }
 0x3f0   :  { %1654 = vsyncadd [#allocation4 + $0x2], 4294959104  ;;  %933 = vmatprep.mubr.f32.mxu1 %v802_v14  ;;  %v806_v10 = vld [vmem:[#allocation2 + $0x408] sm:$0xff]  ;;  %v808_v13 = vld [vmem:[#allocation2 + $0x418] sm:$0xff] }
 0x3f1   :  { %v805_v16 = vld [vmem:[#allocation2 + $0x400] sm:$0xff]  ;;  %v1361_v17 = vpack.c.bf16 %v808_v13, %v806_v10  ;;  %v807_v19 = vld [vmem:[#allocation2 + $0x410] sm:$0xff]  ;;  %v810_v21 = vld [vmem:[#allocation2 + $0x428] sm:$0xff] }
 0x3f2   :  { %v812_v4 = vld [vmem:[#allocation2 + $0x438] sm:$0xff]  ;;  %v1363_v22 = vpack.c.bf16 %v807_v19, %v805_v16  ;;  %v809_v27 = vld [vmem:[#allocation2 + $0x420] sm:$0xff]  ;;  %v811_v20 = vld [vmem:[#allocation2 + $0x430] sm:$0xff] }
 0x3f3   :  { %v1365_v24 = vpack.c.bf16 %v812_v4, %v810_v21  ;;  %v814_v23 = vld [vmem:[#allocation2 + $0x448] sm:$0xff]  ;;  %1362 = vmatprep.subr.bf16.mxu1 %v1361_v17  ;;  %v816_v29 = vld [vmem:[#allocation2 + $0x458] sm:$0xff]  ;;  %v1367_v15 = vpack.c.bf16 %v811_v20, %v809_v27  ;;  %v813_v30 = vld [vmem:[#allocation2 + $0x440] sm:$0xff] }
 0x3f4   :  { %1364 = vmatpush1.bf16.msra.mxu1 %v1363_v22  ;;  %v1369_v18 = vpack.c.bf16 %v816_v29, %v814_v23  ;;  %v815_v1 = vld [vmem:[#allocation2 + $0x450] sm:$0xff]  ;;  %v818_v25 = vld [vmem:[#allocation2 + $0x468] sm:$0xff]  ;;  %v820_v2 = vld [vmem:[#allocation2 + $0x478] sm:$0xff] }
 0x3f5   :  { %1366 = vmatprep.subr.bf16.mxu1 %v1365_v24  ;;  %v1371_v31 = vpack.c.bf16 %v815_v1, %v813_v30  ;;  %v1373_v32 = vpack.c.bf16 %v820_v2, %v818_v25  ;;  %v817_v33 = vld [vmem:[#allocation2 + $0x460] sm:$0xff]  ;;  %v819_v34 = vld [vmem:[#allocation2 + $0x470] sm:$0xff]  ;;  %v822_v35 = vld [vmem:[#allocation2 + $0x488] sm:$0xff] }
 0x3f6   :  { %v824_v36 = vld [vmem:[#allocation2 + $0x498] sm:$0xff]  ;;  %v1375_v37 = vpack.c.bf16 %v819_v34, %v817_v33  ;;  %v821_v28 = vld [vmem:[#allocation2 + $0x480] sm:$0xff]  ;;  %v823_v38 = vld [vmem:[#allocation2 + $0x490] sm:$0xff] }
 0x3f7   :  { %v1377_v26 = vpack.c.bf16 %v824_v36, %v822_v35  ;;  %v826_v39 = vld [vmem:[#allocation2 + $0x4a8] sm:$0xff]  ;;  %v828_v40 = vld [vmem:[#allocation2 + $0x4b8] sm:$0xff]  ;;  %v1379_v41 = vpack.c.bf16 %v823_v38, %v821_v28  ;;  %v825_v43 = vld [vmem:[#allocation2 + $0x4a0] sm:$0xff] }
 0x3f8   :  { %1368 = vmatpush1.bf16.msra.mxu1 %v1367_v15  ;;  %v1381_v42 = vpack.c.bf16 %v828_v40, %v826_v39  ;;  %v827_v44 = vld [vmem:[#allocation2 + $0x4b0] sm:$0xff]  ;;  %v830_v45 = vld [vmem:[#allocation2 + $0x4c8] sm:$0xff]  ;;  %v832_v46 = vld [vmem:[#allocation2 + $0x4d8] sm:$0xff] }
 0x3f9   :  { %1370 = vmatprep.subr.bf16.mxu1 %v1369_v18  ;;  %v1383_v47 = vpack.c.bf16 %v827_v44, %v825_v43  ;;  %v1385_v48 = vpack.c.bf16 %v832_v46, %v830_v45  ;;  %v829_v49 = vld [vmem:[#allocation2 + $0x4c0] sm:$0xff]  ;;  %v831_v50 = vld [vmem:[#allocation2 + $0x4d0] sm:$0xff]  ;;  %v834_v51 = vld [vmem:[#allocation2 + $0x4e8] sm:$0xff] }
 0x3fa   :  { %v836_v52 = vld [vmem:[#allocation2 + $0x4f8] sm:$0xff]  ;;  %v1387_v53 = vpack.c.bf16 %v831_v50, %v829_v49  ;;  %v833_v55 = vld [vmem:[#allocation2 + $0x4e0] sm:$0xff]  ;;  %v835_v56 = vld [vmem:[#allocation2 + $0x4f0] sm:$0xff] }
 0x3fb   :  { %v1389_v54 = vpack.c.bf16 %v836_v52, %v834_v51  ;;  %v838_v57 = vld [vmem:[#allocation2 + $0x508] sm:$0xff]  ;;  %v840_v58 = vld [vmem:[#allocation2 + $0x518] sm:$0xff]  ;;  %v1391_v60 = vpack.c.bf16 %v835_v56, %v833_v55  ;;  %v837_v62 = vld [vmem:[#allocation2 + $0x500] sm:$0xff] }
 0x3fc   :  { %1372 = vmatpush1.bf16.msra.mxu1 %v1371_v31  ;;  %v1393_v61 = vpack.c.bf16 %v840_v58, %v838_v57  ;;  %v839_v63 = vld [vmem:[#allocation2 + $0x510] sm:$0xff]  ;;  %v842_v0 = vld [vmem:[#allocation2 + $0x528] sm:$0xff]  ;;  %v844_v11 = vld [vmem:[#allocation2 + $0x538] sm:$0xff] }
 0x3fd   :  { %1374 = vmatprep.subr.bf16.mxu1 %v1373_v32  ;;  %v1395_v14 = vpack.c.bf16 %v839_v63, %v837_v62  ;;  %v1397_v10 = vpack.c.bf16 %v844_v11, %v842_v0  ;;  %v841_v13 = vld [vmem:[#allocation2 + $0x520] sm:$0xff]  ;;  %v843_v16 = vld [vmem:[#allocation2 + $0x530] sm:$0xff]  ;;  %v846_v17 = vld [vmem:[#allocation2 + $0x548] sm:$0xff] }
 0x3fe   :  { %v848_v19 = vld [vmem:[#allocation2 + $0x558] sm:$0xff]  ;;  %v1399_v21 = vpack.c.bf16 %v843_v16, %v841_v13  ;;  %v845_v22 = vld [vmem:[#allocation2 + $0x540] sm:$0xff]  ;;  %v847_v24 = vld [vmem:[#allocation2 + $0x550] sm:$0xff] }
 0x3ff   :  { %v1401_v4 = vpack.c.bf16 %v848_v19, %v846_v17  ;;  %v850_v27 = vld [vmem:[#allocation2 + $0x568] sm:$0xff]  ;;  %v852_v20 = vld [vmem:[#allocation2 + $0x578] sm:$0xff]  ;;  %v1403_v23 = vpack.c.bf16 %v847_v24, %v845_v22  ;;  %v849_v15 = vld [vmem:[#allocation2 + $0x560] sm:$0xff] }
 0x400   :  { %1376 = vmatpush1.bf16.msra.mxu1 %v1375_v37  ;;  %v1405_v29 = vpack.c.bf16 %v852_v20, %v850_v27  ;;  %v851_v18 = vld [vmem:[#allocation2 + $0x570] sm:$0xff]  ;;  %v854_v30 = vld [vmem:[#allocation2 + $0x588] sm:$0xff]  ;;  %v856_v1 = vld [vmem:[#allocation2 + $0x598] sm:$0xff] }
 0x401   :  { %1378 = vmatprep.subr.bf16.mxu1 %v1377_v26  ;;  %v1407_v25 = vpack.c.bf16 %v851_v18, %v849_v15  ;;  %v1409_v2 = vpack.c.bf16 %v856_v1, %v854_v30  ;;  %v853_v31 = vld [vmem:[#allocation2 + $0x580] sm:$0xff]  ;;  %v855_v32 = vld [vmem:[#allocation2 + $0x590] sm:$0xff]  ;;  %v858_v33 = vld [vmem:[#allocation2 + $0x5a8] sm:$0xff] }
 0x402   :  { %v860_v34 = vld [vmem:[#allocation2 + $0x5b8] sm:$0xff]  ;;  %v1411_v35 = vpack.c.bf16 %v855_v32, %v853_v31  ;;  %v857_v37 = vld [vmem:[#allocation2 + $0x5a0] sm:$0xff]  ;;  %v859_v26 = vld [vmem:[#allocation2 + $0x5b0] sm:$0xff] }
 0x403   :  { %v1413_v36 = vpack.c.bf16 %v860_v34, %v858_v33  ;;  %v862_v28 = vld [vmem:[#allocation2 + $0x5c8] sm:$0xff]  ;;  %v864_v38 = vld [vmem:[#allocation2 + $0x5d8] sm:$0xff]  ;;  %v1415_v39 = vpack.c.bf16 %v859_v26, %v857_v37 }
 0x404   :  { %1380 = vmatpush1.bf16.msra.mxu1 %v1379_v41  ;;  %v1417_v40 = vpack.c.bf16 %v864_v38, %v862_v28  ;;  %v861_v41 = vld [vmem:[#allocation2 + $0x5c0] sm:$0xff]  ;;  %v866_v43 = vld [vmem:[#allocation2 + $0x5e8] sm:$0xff]  ;;  %v868_v44 = vld [vmem:[#allocation2 + $0x5f8] sm:$0xff] }
 0x405   :  { %1382 = vmatprep.subr.bf16.mxu1 %v1381_v42  ;;  %v863_v42 = vld [vmem:[#allocation2 + $0x5d0] sm:$0xff]  ;;  %v1421_v46 = vpack.c.bf16 %v868_v44, %v866_v43 }
 0x406   :  { %v1419_v45 = vpack.c.bf16 %v863_v42, %v861_v41 }
 0x408   :  { %1384 = vmatpush1.bf16.msra.mxu1 %v1383_v47  ;;  %v865_v47 = vld [vmem:[#allocation2 + $0x5e0] sm:$0xff] }
 0x409   :  { %1386 = vmatprep.subr.bf16.mxu1 %v1385_v48  ;;  %v867_v48 = vld [vmem:[#allocation2 + $0x5f0] sm:$0xff] }
 0x40a   :  { %v1423_v49 = vpack.c.bf16 %v867_v48, %v865_v47 }
 0x40c   :  { %1388 = vmatpush1.bf16.msra.mxu1 %v1387_v53 }
 0x40d   :  { %1390 = vmatprep.subr.bf16.mxu1 %v1389_v54 }
 0x410   :  { %1392 = vmatpush1.bf16.msra.mxu1 %v1391_v60 }
 0x411   :  { %1394 = vmatprep.subr.bf16.mxu1 %v1393_v61 }
 0x414   :  { %1396 = vmatpush1.bf16.msra.mxu1 %v1395_v14 }
 0x415   :  { %1398 = vmatprep.subr.bf16.mxu1 %v1397_v10 }
 0x418   :  { %1400 = vmatpush1.bf16.msra.mxu1 %v1399_v21 }
 0x419   :  { %1402 = vmatprep.subr.bf16.mxu1 %v1401_v4 }
 0x41c   :  { %1404 = vmatpush1.bf16.msra.mxu1 %v1403_v23 }
 0x41d   :  { %1406 = vmatprep.subr.bf16.mxu1 %v1405_v29 }
 0x420   :  { %1408 = vmatpush1.bf16.msra.mxu1 %v1407_v25 }
 0x421   :  { %1410 = vmatprep.subr.bf16.mxu1 %v1409_v2 }
 0x424   :  { %1412 = vmatpush1.bf16.msra.mxu1 %v1411_v35 }
 0x425   :  { %1414 = vmatprep.subr.bf16.mxu1 %v1413_v36 }
 0x428   :  { %1416 = vmatpush1.bf16.msra.mxu1 %v1415_v39 }
 0x429   :  { %1418 = vmatprep.subr.bf16.mxu1 %v1417_v40 }
 0x42c   :  { %1420 = vmatpush1.bf16.msra.mxu1 %v1419_v45 }
 0x42d   :  { %1422 = vmatprep.subr.bf16.mxu1 %v1421_v46 }
 0x430   :  { %1424 = vmatpush1.bf16.msra.mxu1 %v1423_v49 }
 0x433   :  { %934 = vmatmul.mubr.f32.vlgmr.msra.gmra.mrb[2].mxu1 %v801_v12 }
 0x506   :  { %v935_v50 = vpop.f32.mrb[2].mxu1 }
 0x507   :  { %v940_v51 = vmul.f32 %v935_v50, %v935_v50  ;;  %v942_v52 = vrot.slane %v935_v50, 4  ;;  %v937_v53 = vpop.f32.mrb[3].mxu1 }
 0x508   :  { %v941_v54 = vmul.f32 %v937_v53, %v937_v53  ;;  %v948_v55 = vrot.slane %v937_v53, 4 }
 0x509   :  { %v943_v56 = vadd.f32 %v942_v52, %v935_v50  ;;  %v956_v57 = vrot.slane %v940_v51, 4 }
 0x50a   :  { %v949_v58 = vadd.f32 %v948_v55, %v937_v53  ;;  %v962_v60 = vrot.slane %v941_v54, 4 }
 0x50b   :  { %v944_v61 = vrot.slane %v943_v56, 2  ;;  %v957_v62 = vadd.f32 %v956_v57, %v940_v51 }
 0x50c   :  { %v950_v63 = vrot.slane %v949_v58, 2  ;;  %v963_v0 = vadd.f32 %v962_v60, %v941_v54 }
 0x50d   :  { %v945_v11 = vadd.f32 %v944_v61, %v943_v56  ;;  %v958_v14 = vrot.slane %v957_v62, 2 }
 0x50e   :  { %v951_v10 = vadd.f32 %v950_v63, %v949_v58  ;;  %v964_v13 = vrot.slane %v963_v0, 2 }
 0x50f   :  { %v946_v3 = vrot.slane %v945_v11, 1  ;;  %v959_v12 = vadd.f32 %v958_v14, %v957_v62 }
 0x510   :  { %v952_v16 = vrot.slane %v951_v10, 1  ;;  %v965_v17 = vadd.f32 %v964_v13, %v963_v0 }
 0x511   :  { %v947_v19 = vadd.f32 %v946_v3, %v945_v11  ;;  %v960_v21 = vrot.slane %v959_v12, 1 }
 0x512   :  { %v953_v4 = vadd.f32 %v952_v16, %v951_v10  ;;  %v966_v22 = vrot.slane %v965_v17, 1 }
 0x513   :  { %v954_v24 = vmul.f32 0.125, %v947_v19  ;;  %v961_v27 = vadd.f32 %v960_v21, %v959_v12 }
 0x514   :  { %v955_v20 = vmul.f32 0.125, %v953_v4  ;;  %v967_v23 = vadd.f32 %v966_v22, %v965_v17 }
 0x515   :  { %v968_v29 = vmul.f32 0.125, %v961_v27  ;;  %v970_v15 = vmul.f32 %v954_v24, %v954_v24 }
 0x516   :  { %v969_v18 = vmul.f32 0.125, %v967_v23  ;;  %v971_v30 = vmul.f32 %v955_v20, %v955_v20 }
 0x517   :  { %v972_v1 = vsub.f32 %v968_v29, %v970_v15 }
 0x518   :  { %v973_v25 = vsub.f32 %v969_v18, %v971_v30 }
 0x519   :  { %v974_v2 = vadd.f32 1e-05, %v972_v1 }
 0x51a   :  { %v975_v31 = vadd.f32 1e-05, %v973_v25 }
 0x51b   :  { %1481 = vrsqrt.f32 %v974_v2 }
 0x51c   :  { %1483 = vrsqrt.f32 %v975_v31 }
 0x525   :  { %v1482_v32 = vpop.eup %1481 }
 0x526   :  { %v1484_v33 = vpop.eup %1483 }
 0x527   :  { %v980_v34 = vcombine.low %v1482_v32, %v1484_v33 }
 0x529   :  { %v987_v35 = vrot.slane %v980_v34, %v1842_v59 }
 0x52b   :  { %v994_v36 = vrot.slane %v987_v35, %v1842_v59 }
 0x52d   :  { %v996_v37 = vmul.f32 %v994_v36, %v1749_v5 }
 0x52f   :  { %v1001_v26 = vrot.slane %v996_v37, %v1846_v8  ;;  %v1005_v28 = vrot.slane %v996_v37, %v1848_v9 }
 0x531   :  { %v1008_v38 = vmul.f32 %v1001_v26, %v954_v24  ;;  %v1009_v39 = vmul.f32 %v1005_v28, %v955_v20  ;;  %v1029_v40 = vmul.f32 %v1001_v26, %v935_v50  ;;  %v1030_v41 = vmul.f32 %v1005_v28, %v937_v53 }
 0x533   :  { %v1012_v42 = vcombine.low %v1008_v38, %v1009_v39 }
 0x535   :  { %v1019_v43 = vrot.slane %v1012_v42, %v1842_v59 }
 0x537   :  { %v1026_v44 = vrot.slane %v1019_v43, %v1842_v59 }
 0x539   :  { %v1028_v45 = vsub.f32 %v1751_v6, %v1026_v44 }
 0x53b   :  { %v1035_v46 = vrot.slane %v1028_v45, %v1846_v8  ;;  %v1039_v47 = vrot.slane %v1028_v45, %v1848_v9 }
 0x53d   :  { %v1901_v5 = vadd.f32 %v1035_v46, %v1029_v40  ;;  %v1043_v48 = vadd.f32 %v1039_v47, %v1030_v41 }
 0x53f   :  { %v1044_v49 = vmax.f32 %v1901_v5, 0.0  ;;  %v1045_v51 = vmax.f32 %v1043_v48, 0.0 }
 0x540   :  { %1655 = dma.done.wait [#allocation4 + $0x3], 4096 }
 0x541   :  { %1656 = vsyncadd [#allocation4 + $0x3], 4294963200  ;;  %1145 = vmatprep.mubr.f32.mxu0 %v1045_v51  ;;  %v1065_v50 = vld [vmem:[#allocation3 + $0x80] sm:$0xff]  ;;  %v1066_v52 = vld [vmem:[#allocation3 + $0x88] sm:$0xff] }
 0x542   :  { %v1049_v53 = vld [vmem:[#allocation3] sm:$0xff]  ;;  %v1425_v54 = vpack.c.bf16 %v1066_v52, %v1065_v50  ;;  %v1050_v59 = vld [vmem:[#allocation3 + $0x8] sm:$0xff]  ;;  %v1067_v55 = vld [vmem:[#allocation3 + $0x90] sm:$0xff] }
 0x543   :  { %v1068_v6 = vld [vmem:[#allocation3 + $0x98] sm:$0xff]  ;;  %v1427_v56 = vpack.c.bf16 %v1050_v59, %v1049_v53  ;;  %v1051_v57 = vld [vmem:[#allocation3 + $0x10] sm:$0xff]  ;;  %v1069_v58 = vld [vmem:[#allocation3 + $0xa0] sm:$0xff] }
 0x544   :  { %v1429_v8 = vpack.c.bf16 %v1068_v6, %v1067_v55  ;;  %v1052_v9 = vld [vmem:[#allocation3 + $0x18] sm:$0xff]  ;;  %1426 = vmatprep.subr.bf16.mxu0 %v1425_v54  ;;  %v1070_v60 = vld [vmem:[#allocation3 + $0xa8] sm:$0xff]  ;;  %v1053_v63 = vld [vmem:[#allocation3 + $0x20] sm:$0xff] }
 0x545   :  { %1428 = vmatpush3.bf16.msra.mxu0 %v1427_v56  ;;  %v1431_v61 = vpack.c.bf16 %v1052_v9, %v1051_v57  ;;  %v1433_v62 = vpack.c.bf16 %v1070_v60, %v1069_v58  ;;  %v1054_v0 = vld [vmem:[#allocation3 + $0x28] sm:$0xff]  ;;  %v1071_v11 = vld [vmem:[#allocation3 + $0xb0] sm:$0xff]  ;;  %v1072_v14 = vld [vmem:[#allocation3 + $0xb8] sm:$0xff] }
 0x546   :  { %1430 = vmatprep.subr.bf16.mxu0 %v1429_v8  ;;  %v1435_v10 = vpack.c.bf16 %v1054_v0, %v1053_v63  ;;  %v1437_v13 = vpack.c.bf16 %v1072_v14, %v1071_v11  ;;  %v1055_v3 = vld [vmem:[#allocation3 + $0x30] sm:$0xff]  ;;  %v1056_v12 = vld [vmem:[#allocation3 + $0x38] sm:$0xff]  ;;  %v1073_v16 = vld [vmem:[#allocation3 + $0xc0] sm:$0xff] }
 0x547   :  { %v1074_v17 = vld [vmem:[#allocation3 + $0xc8] sm:$0xff]  ;;  %v1439_v19 = vpack.c.bf16 %v1056_v12, %v1055_v3  ;;  %v1057_v4 = vld [vmem:[#allocation3 + $0x40] sm:$0xff]  ;;  %v1075_v24 = vld [vmem:[#allocation3 + $0xd0] sm:$0xff] }
 0x548   :  { %v1441_v21 = vpack.c.bf16 %v1074_v17, %v1073_v16  ;;  %v1058_v22 = vld [vmem:[#allocation3 + $0x48] sm:$0xff]  ;;  %v1076_v27 = vld [vmem:[#allocation3 + $0xd8] sm:$0xff]  ;;  %v1059_v29 = vld [vmem:[#allocation3 + $0x50] sm:$0xff] }
 0x549   :  { %1432 = vmatpush3.bf16.msra.mxu0 %v1431_v61  ;;  %v1443_v20 = vpack.c.bf16 %v1058_v22, %v1057_v4  ;;  %v1445_v23 = vpack.c.bf16 %v1076_v27, %v1075_v24  ;;  %v1060_v15 = vld [vmem:[#allocation3 + $0x58] sm:$0xff]  ;;  %v1077_v18 = vld [vmem:[#allocation3 + $0xe0] sm:$0xff]  ;;  %v1078_v30 = vld [vmem:[#allocation3 + $0xe8] sm:$0xff] }
 0x54a   :  { %1434 = vmatprep.subr.bf16.mxu0 %v1433_v62  ;;  %v1447_v1 = vpack.c.bf16 %v1060_v15, %v1059_v29  ;;  %v1449_v25 = vpack.c.bf16 %v1078_v30, %v1077_v18  ;;  %v1061_v2 = vld [vmem:[#allocation3 + $0x60] sm:$0xff]  ;;  %v1062_v31 = vld [vmem:[#allocation3 + $0x68] sm:$0xff]  ;;  %v1079_v32 = vld [vmem:[#allocation3 + $0xf0] sm:$0xff] }
 0x54b   :  { %v1080_v33 = vld [vmem:[#allocation3 + $0xf8] sm:$0xff]  ;;  %v1451_v34 = vpack.c.bf16 %v1062_v31, %v1061_v2  ;;  %v1063_v36 = vld [vmem:[#allocation3 + $0x70] sm:$0xff] }
 0x54c   :  { %v1453_v35 = vpack.c.bf16 %v1080_v33, %v1079_v32  ;;  %v1064_v37 = vld [vmem:[#allocation3 + $0x78] sm:$0xff] }
 0x54d   :  { %1436 = vmatpush3.bf16.msra.mxu0 %v1435_v10  ;;  %v1455_v26 = vpack.c.bf16 %v1064_v37, %v1063_v36 }
 0x54e   :  { %1438 = vmatprep.subr.bf16.mxu0 %v1437_v13 }
 0x551   :  { %1440 = vmatpush3.bf16.msra.mxu0 %v1439_v19 }
 0x552   :  { %1442 = vmatprep.subr.bf16.mxu0 %v1441_v21 }
 0x555   :  { %1444 = vmatpush3.bf16.msra.mxu0 %v1443_v20 }
 0x556   :  { %1446 = vmatprep.subr.bf16.mxu0 %v1445_v23 }
 0x559   :  { %1448 = vmatpush3.bf16.msra.mxu0 %v1447_v1 }
 0x55a   :  { %1450 = vmatprep.subr.bf16.mxu0 %v1449_v25 }
 0x55d   :  { %1452 = vmatpush3.bf16.msra.mxu0 %v1451_v34 }
 0x55e   :  { %1454 = vmatprep.subr.bf16.mxu0 %v1453_v35 }
 0x561   :  { %1456 = vmatpush3.bf16.msra.mxu0 %v1455_v26 }
 0x564   :  { %1146 = vmatmul.mubr.f32.vlgmr.msra.gmra.mrb[4].mxu0 %v1044_v49 }
 0x637   :  { %v1224_v28 = vpop.f32.mrb[4].mxu0 }
 0x638   :  { %v1225_v38 = vpop.f32.mrb[5].mxu0 }
 0x639   :  { %v1226_v39 = vadd.f32 %v1225_v38, %v1224_v28 }
 0x63b   :  { %v1148_v40 = vadd.f32 %v1226_v39, %v1753_v7 }
 0x63d   :  { %1151 = vst [vmem:[%s1915_s5] sm:$0xff] %v1148_v40 }
 0x63e   :  { %1156 = vsyncpa [#allocation6], 1 }
 0x63f   :  { %1157 = vsyncpa [#allocation8], 1 }
 0x640   :  { %1158 = vsyncmov [#allocation4] }
 0x643   :  { %s1159_s1 = vpop.sfrf %1158 }
 0x644   :  { %p1188_p9 = scmp.ne.s32.totalorder %s1159_s1, 0 }
 0x646   :  { %1163 = shalt.err (%p1188_p9)  }
 0x647   :  { %1165 = vsyncmov [#allocation4 + $0x1] }
 0x64a   :  { %s1166_s18 = vpop.sfrf %1165 }
 0x64b   :  { %p1189_p10 = scmp.ne.s32.totalorder %s1166_s18, 0 }
 0x64d   :  { %1170 = shalt.err (%p1189_p10)  }
 0x64e   :  { %1172 = vsyncmov [#allocation4 + $0x2] }
 0x651   :  { %s1173_s19 = vpop.sfrf %1172 }
 0x652   :  { %p1190_p11 = scmp.ne.s32.totalorder %s1173_s19, 0 }
 0x654   :  { %1177 = shalt.err (%p1190_p11)  }
 0x655   :  { %1179 = vsyncmov [#allocation4 + $0x3] }
 0x658   :  { %s1180_s20 = vpop.sfrf %1179 }
 0x659   :  { %p1191_p13 = scmp.ne.s32.totalorder %s1180_s20, 0 }
 0x65b   :  { %1184 = shalt.err (%p1191_p13)  }

</bundles_post_ra>
